<compile_context>
chip_gen: v5e
topology: v5e:2x2
jax: 0.10.0
libtpu: 0.0.40
codegen_flags: <defaults>
</compile_context>

<pallas_src>
import math
from functools import partial

import jax
import jax.numpy as jnp
from jax.experimental import pallas as pl
from jax.experimental.pallas import tpu as pltpu

# ----------------------- small ViT configuration -----------------------
INPUT_RES = 32      # input_resolution
PATCH = 16          # patch_size
WIDTH = 64          # width (embed dim)
LAYERS = 12         # layers (out_indices hard-codes 11, so keep 12)
HEADS = 4           # heads
OUTPUT_DIM = 32     # output_dim
OUT_INDICES = [6, 7, 8, 11]
EPS = 1e-5          # nn.LayerNorm default eps

NORM_OUT = tuple(i for i in OUT_INDICES if i != LAYERS - 1)   # (6, 7, 8)
LAST_OUT = LAYERS - 1                                         # 11


# ----------------------------- fused kernel -----------------------------
def _ln(x, g, b):
    mu = jnp.mean(x, axis=-1, keepdims=True)
    xc = x - mu
    var = jnp.mean(xc * xc, axis=-1, keepdims=True)
    return xc * jax.lax.rsqrt(var + EPS) * g + b


def _vit_fused_kernel(patches_ref, conv_w_ref, gcat_ref, pos_ref,
                      wA_ref, wB_ref, bA_ref, lnv_ref, proj_ref,
                      feats_ref, final_ref,
                      x_sc,
                      *, heads, norm_layers, last_layer):
    l = pl.program_id(1)
    L, C = x_sc.shape
    D = C // heads

    # ---- prologue (only at l == 0): patch embed + cls + pos + ln_pre ----
    @pl.when(l == 0)
    def _():
        tok = jnp.dot(patches_ref[...], conv_w_ref[...],
                      preferred_element_type=jnp.float32)        # (HW, C)
        x_sc[0:1, :] = gcat_ref[0:1, :]                          # class token
        x_sc[1:, :] = tok
        x0 = x_sc[...] + pos_ref[...]
        x_sc[...] = _ln(x0, gcat_ref[1:2, :], gcat_ref[2:3, :])  # ln_pre

    # ---- residual attention block `l` (CLIP pre-LN) ----
    x = x_sc[...]                                                # (L, C)

    # Unpack this layer's consolidated weights (all slices start at offset 0).
    wqkv = wA_ref[0:C, 0:3 * C]          # (C, 3C)  -- q-scale pre-folded
    w1 = wA_ref[C:2 * C, :]              # (C, 4C)
    w2 = wB_ref[0:4 * C, :]              # (4C, C)
    wo = wB_ref[4 * C:5 * C, :]          # (C, C)
    bqkv = bA_ref[0:1, 0:3 * C]          # (1, 3C)
    b1 = bA_ref[1:2, :]                  # (1, 4C)
    ln1g, ln1b, bo = lnv_ref[0:1, :], lnv_ref[1:2, :], lnv_ref[2:3, :]
    ln2g, ln2b, b2 = lnv_ref[3:4, :], lnv_ref[4:5, :], lnv_ref[5:6, :]

    h = _ln(x, ln1g, ln1b)
    qkv = jnp.dot(h, wqkv, preferred_element_type=jnp.float32) + bqkv
    head_outs = []
    for hh in range(heads):              # static unroll, tiny head count
        q = qkv[:, hh * D:(hh + 1) * D]                 # scale folded in wqkv
        k = qkv[:, C + hh * D:C + (hh + 1) * D]
        v = qkv[:, 2 * C + hh * D:2 * C + (hh + 1) * D]
        s = jax.lax.dot_general(q, k, (((1,), (1,)), ((), ())),
                                preferred_element_type=jnp.float32)
        s = s - jnp.max(s, axis=-1, keepdims=True)
        p = jnp.exp(s)
        p = p * pl.reciprocal(jnp.sum(p, axis=-1, keepdims=True), approx=True)
        head_outs.append(jnp.dot(p, v, preferred_element_type=jnp.float32))
    attn = jnp.dot(jnp.concatenate(head_outs, axis=-1), wo,
                   preferred_element_type=jnp.float32) + bo
    x = x + attn

    h2 = _ln(x, ln2g, ln2b)
    m = jnp.dot(h2, w1, preferred_element_type=jnp.float32) + b1
    m = m * jax.nn.sigmoid(1.702 * m)                   # QuickGELU (CLIP)
    m = jnp.dot(m, w2, preferred_element_type=jnp.float32) + b2
    x = x + m
    x_sc[...] = x

    # ---- intermediate features: per-token l2 norm (no eps, torch .norm) ----
    for slot, li in enumerate(norm_layers):
        @pl.when(l == li)
        def _(slot=slot):
            t = x[1:, :]                                # drop class token
            inv = jax.lax.rsqrt(jnp.sum(t * t, axis=-1, keepdims=True))
            feats_ref[slot] = t * inv

    # ---- final feature: ln_post -> proj -> l2 norm at the last out index ----
    @pl.when(l == last_layer)
    def _():
        t = _ln(x[1:, :], gcat_ref[3:4, :], gcat_ref[4:5, :])
        t = jnp.dot(t, proj_ref[...], preferred_element_type=jnp.float32)
        inv = jax.lax.rsqrt(jnp.sum(t * t, axis=-1, keepdims=True))
        final_ref[...] = t * inv


# ----------------------------- parameter init -----------------------------
def init_params(key):
    scale = WIDTH ** (-0.5)
    spatial = INPUT_RES // PATCH
    ks = jax.random.split(key, 5)
    params = {
        'conv1': 0.02 * jax.random.normal(ks[0], (WIDTH, 3, PATCH, PATCH),
                                          jnp.float32),
        'class_embedding': scale * jax.random.normal(ks[1], (WIDTH,),
                                                     jnp.float32),
        'positional_embedding': scale * jax.random.normal(
            ks[2], (spatial * spatial + 1, WIDTH), jnp.float32),
        'ln_pre_g': jnp.ones((WIDTH,), jnp.float32),
        'ln_pre_b': jnp.zeros((WIDTH,), jnp.float32),
        'ln_post_g': jnp.ones((WIDTH,), jnp.float32),
        'ln_post_b': jnp.zeros((WIDTH,), jnp.float32),
        'proj': scale * jax.random.normal(ks[3], (WIDTH, OUTPUT_DIM),
                                          jnp.float32),
    }
    bk = jax.random.split(ks[4], 4)
    params['blocks'] = {
        'ln1_g': jnp.ones((LAYERS, 1, WIDTH), jnp.float32),
        'ln1_b': jnp.zeros((LAYERS, 1, WIDTH), jnp.float32),
        'wqkv': 0.02 * jax.random.normal(bk[0], (LAYERS, WIDTH, 3 * WIDTH),
                                         jnp.float32),
        'bqkv': jnp.zeros((LAYERS, 1, 3 * WIDTH), jnp.float32),
        'wo': 0.02 * jax.random.normal(bk[1], (LAYERS, WIDTH, WIDTH),
                                       jnp.float32),
        'bo': jnp.zeros((LAYERS, 1, WIDTH), jnp.float32),
        'ln2_g': jnp.ones((LAYERS, 1, WIDTH), jnp.float32),
        'ln2_b': jnp.zeros((LAYERS, 1, WIDTH), jnp.float32),
        'w1': 0.02 * jax.random.normal(bk[2], (LAYERS, WIDTH, 4 * WIDTH),
                                       jnp.float32),
        'b1': jnp.zeros((LAYERS, 1, 4 * WIDTH), jnp.float32),
        'w2': 0.02 * jax.random.normal(bk[3], (LAYERS, 4 * WIDTH, WIDTH),
                                       jnp.float32),
        'b2': jnp.zeros((LAYERS, 1, WIDTH), jnp.float32),
    }
    return params


def pack_params(params):
    """One-time (outside the jitted forward) repack into kernel layout."""
    C = WIDTH
    blk = params['blocks']
    scale = (C // HEADS) ** (-0.5)
    # Fold the 1/sqrt(D) attention scale into the q columns of wqkv / bqkv.
    qscale = jnp.concatenate([jnp.full((C,), scale, jnp.float32),
                              jnp.ones((2 * C,), jnp.float32)])
    wqkv = blk['wqkv'] * qscale
    bqkv = blk['bqkv'] * qscale

    wA = jnp.zeros((LAYERS, 2 * C, 4 * C), jnp.float32)
    wA = wA.at[:, :C, :3 * C].set(wqkv)          # rows 0:C  = wqkv (+ pad)
    wA = wA.at[:, C:, :].set(blk['w1'])          # rows C:2C = mlp fc1
    bA = jnp.zeros((LAYERS, 2, 4 * C), jnp.float32)
    bA = bA.at[:, 0:1, :3 * C].set(bqkv)
    bA = bA.at[:, 1:2, :].set(blk['b1'])

    return {
        'conv_w': params['conv1'].reshape(C, -1).T,              # (KP, C)
        'gcat': jnp.concatenate([                                # (5, C)
            params['class_embedding'].reshape(1, C),
            params['ln_pre_g'].reshape(1, C), params['ln_pre_b'].reshape(1, C),
            params['ln_post_g'].reshape(1, C), params['ln_post_b'].reshape(1, C),
        ], axis=0),
        'pos': params['positional_embedding'],                   # (S*S+1, C)
        'wA': wA,                                                # (L, 2C, 4C)
        'wB': jnp.concatenate([blk['w2'], blk['wo']], axis=1),   # (L, 5C, C)
        'bA': bA,                                                # (L, 2, 4C)
        'lnv': jnp.concatenate([blk['ln1_g'], blk['ln1_b'], blk['bo'],
                                blk['ln2_g'], blk['ln2_b'], blk['b2']],
                               axis=1),                          # (L, 6, C)
        'proj': params['proj'],                                  # (C, OUT)
    }


# ------------------------------- forward ----------------------------------
def vit_forward(packed, x_nchw):
    B, Cin, Himg, Wimg = x_nchw.shape
    p = PATCH
    H, W = Himg // p, Wimg // p
    HW = H * W
    L = HW + 1
    spatial = INPUT_RES // p
    C = WIDTH
    KP = Cin * p * p
    OUT = OUTPUT_DIM
    NF = len(NORM_OUT)

    # conv1 (stride == kernel) as im2col; the matmul itself runs in-kernel.
    patches = (x_nchw.reshape(B, Cin, H, p, W, p)
               .transpose(0, 2, 4, 1, 3, 5)
               .reshape(B, HW, KP))

    # positional embedding (bilinear resize of spatial part; identity here)
    pos = packed['pos']
    cls_pos = pos[0:1]
    sp = pos[1:].reshape(spatial, spatial, C)
    if (H, W) != (spatial, spatial):
        # TODO(synk): jax.image bilinear ~ F.interpolate; identity for our config.
        sp = jax.image.resize(sp, (H, W, C), method='bilinear')
    pos_full = jnp.concatenate([cls_pos, sp.reshape(HW, C)], axis=0)   # (L, C)

    grid_spec = pltpu.PrefetchScalarGridSpec(
        num_scalar_prefetch=0,
        grid=(B, LAYERS),                        # layer axis innermost
        in_specs=[
            pl.BlockSpec((None, HW, KP), lambda b, l: (b, 0, 0)),     # patches
            pl.BlockSpec((KP, C), lambda b, l: (0, 0)),               # conv1 w
            pl.BlockSpec((5, C), lambda b, l: (0, 0)),                # cls+ln_pre+ln_post
            pl.BlockSpec((L, C), lambda b, l: (0, 0)),                # pos embed
            pl.BlockSpec((None, 2 * C, 4 * C), lambda b, l: (l, 0, 0)),  # wqkv|w1
            pl.BlockSpec((None, 5 * C, C), lambda b, l: (l, 0, 0)),      # w2;wo
            pl.BlockSpec((None, 2, 4 * C), lambda b, l: (l, 0, 0)),      # bqkv;b1
            pl.BlockSpec((None, 6, C), lambda b, l: (l, 0, 0)),          # ln/bias vecs
            pl.BlockSpec((C, OUT), lambda b, l: (0, 0)),              # proj
        ],
        out_specs=(
            pl.BlockSpec((None, NF, HW, C), lambda b, l: (b, 0, 0, 0)),  # feats 6,7,8
            pl.BlockSpec((None, HW, OUT), lambda b, l: (b, 0, 0)),       # final @ 11
        ),
        scratch_shapes=[
            pltpu.VMEM((L, C), jnp.float32),     # activation, VMEM-resident
        ],
    )

    feats_norm, final_feat = pl.pallas_call(
        partial(_vit_fused_kernel, heads=HEADS,
                norm_layers=NORM_OUT, last_layer=LAST_OUT),
        out_shape=(jax.ShapeDtypeStruct((B, NF, HW, C), jnp.float32),
                   jax.ShapeDtypeStruct((B, HW, OUT), jnp.float32)),
        grid_spec=grid_spec,
        compiler_params=pltpu.CompilerParams(
            dimension_semantics=("parallel", "arbitrary")),
    )(patches, packed['conv_w'], packed['gcat'], pos_full,
      packed['wA'], packed['wB'], packed['bA'], packed['lnv'], packed['proj'])

    features = [feats_norm[:, s].transpose(0, 2, 1).reshape(B, C, H, W)
                for s in range(NF)]
    features.append(final_feat.transpose(0, 2, 1).reshape(B, OUT, H, W))
    return tuple(features)


# --------------------------------- main ------------------------------------
if __name__ == "__main__":
    key = jax.random.PRNGKey(0)
    pkey, xkey = jax.random.split(key)
    params = init_params(pkey)
    packed = pack_params(params)          # one-time repack, outside the jit
    x = jax.random.normal(xkey, (2, 3, INPUT_RES, INPUT_RES), jnp.float32)

    feats = jax.jit(vit_forward)(packed, x)
    feats = jax.block_until_ready(feats)

    B, H, W = 2, INPUT_RES // PATCH, INPUT_RES // PATCH
    assert len(feats) == len(OUT_INDICES)
    assert feats[0].shape == (B, WIDTH, H, W)
    assert feats[1].shape == (B, WIDTH, H, W)
    assert feats[2].shape == (B, WIDTH, H, W)
    assert feats[-1].shape == (B, OUTPUT_DIM, H, W)
    assert all(bool(jnp.all(jnp.isfinite(f))) for f in feats)
    print("KERNEL_OK")
</pallas_src>

<mosaic_0001>
module attributes {stable_mosaic.version = 11 : i64} {
  func.func @_vit_fused_kernel(%arg0: i32, %arg1: i32, %arg2: memref<1x4x768xf32, #tpu.memory_space<vmem>>, %arg3: memref<768x64xf32, #tpu.memory_space<vmem>>, %arg4: memref<5x64xf32, #tpu.memory_space<vmem>>, %arg5: memref<5x64xf32, #tpu.memory_space<vmem>>, %arg6: memref<1x128x256xf32, #tpu.memory_space<vmem>>, %arg7: memref<1x320x64xf32, #tpu.memory_space<vmem>>, %arg8: memref<1x2x256xf32, #tpu.memory_space<vmem>>, %arg9: memref<1x6x64xf32, #tpu.memory_space<vmem>>, %arg10: memref<64x32xf32, #tpu.memory_space<vmem>>, %arg11: memref<1x3x4x64xf32, #tpu.memory_space<vmem>>, %arg12: memref<1x4x32xf32, #tpu.memory_space<vmem>>, %arg13: memref<5x64xf32, #tpu.memory_space<vmem>>) attributes {dimension_semantics = [#tpu.dimension_semantics<parallel>, #tpu.dimension_semantics<arbitrary>], iteration_bounds = array<i64: 2, 12>, scalar_prefetch = 0 : i64, scratch_operands = 1 : i64, tpu.core_type = #tpu.core_type<tc>, window_params = [{transform_indices = @transform_0, window_bounds = array<i64: 1, 4, 768>}, {pipeline_mode = #tpu.pipeline_mode<synchronous>, transform_indices = @transform_1, window_bounds = array<i64: 768, 64>}, {pipeline_mode = #tpu.pipeline_mode<synchronous>, transform_indices = @transform_2, window_bounds = array<i64: 5, 64>}, {pipeline_mode = #tpu.pipeline_mode<synchronous>, transform_indices = @transform_3, window_bounds = array<i64: 5, 64>}, {transform_indices = @transform_4, window_bounds = array<i64: 1, 128, 256>}, {transform_indices = @transform_5, window_bounds = array<i64: 1, 320, 64>}, {transform_indices = @transform_6, window_bounds = array<i64: 1, 2, 256>}, {transform_indices = @transform_7, window_bounds = array<i64: 1, 6, 64>}, {pipeline_mode = #tpu.pipeline_mode<synchronous>, transform_indices = @transform_8, window_bounds = array<i64: 64, 32>}, {transform_indices = @transform_9, window_bounds = array<i64: 1, 3, 4, 64>}, {transform_indices = @transform_10, window_bounds = array<i64: 1, 4, 32>}]} {
    %c0_i32 = arith.constant 0 : i32
    %0 = arith.cmpi eq, %arg1, %c0_i32 : i32
    %1 = arith.extui %0 : i1 to i32
    %c0_i32_0 = arith.constant 0 : i32
    %2 = arith.cmpi ne, %1, %c0_i32_0 : i32
    scf.if %2 {
      %c0_68 = arith.constant 0 : index
      %c0_69 = arith.constant 0 : index
      %c0_70 = arith.constant 0 : index
      %164 = vector.load %arg2[%c0_68, %c0_69, %c0_70] : memref<1x4x768xf32, #tpu.memory_space<vmem>>, vector<1x4x768xf32>
      %165 = vector.shape_cast %164 : vector<1x4x768xf32> to vector<4x768xf32>
      %c0_71 = arith.constant 0 : index
      %c0_72 = arith.constant 0 : index
      %166 = vector.load %arg3[%c0_71, %c0_72] : memref<768x64xf32, #tpu.memory_space<vmem>>, vector<768x64xf32>
      %cst_73 = arith.constant dense<0.000000e+00> : vector<4x64xf32>
      %167 = tpu.matmul %165, %166, %cst_73 {dimension_numbers = #tpu.dot_dimension_numbers<[1], [0], [0], [1], [0, 0, 1, 1], [], []>} : vector<4x768xf32>, vector<768x64xf32>, vector<4x64xf32> -> vector<4x64xf32>
      %c0_74 = arith.constant 0 : index
      %c0_75 = arith.constant 0 : index
      %168 = vector.load %arg4[%c0_74, %c0_75] : memref<5x64xf32, #tpu.memory_space<vmem>>, vector<1x64xf32>
      %c0_76 = arith.constant 0 : index
      %c0_77 = arith.constant 0 : index
      %169 = vector.load %arg13[%c0_76, %c0_77] : memref<5x64xf32, #tpu.memory_space<vmem>>, vector<1x64xf32>
      tpu.vector_store %arg13[%c0_76, %c0_77], %168 {strides = array<i32>} : memref<5x64xf32, #tpu.memory_space<vmem>>, vector<1x64xf32>,
      %c1_78 = arith.constant 1 : index
      %c0_79 = arith.constant 0 : index
      %170 = vector.load %arg13[%c1_78, %c0_79] : memref<5x64xf32, #tpu.memory_space<vmem>>, vector<4x64xf32>
      tpu.vector_store %arg13[%c1_78, %c0_79], %167 {strides = array<i32>} : memref<5x64xf32, #tpu.memory_space<vmem>>, vector<4x64xf32>,
      %c0_80 = arith.constant 0 : index
      %c0_81 = arith.constant 0 : index
      %171 = vector.load %arg13[%c0_80, %c0_81] : memref<5x64xf32, #tpu.memory_space<vmem>>, vector<5x64xf32>
      %c0_82 = arith.constant 0 : index
      %c0_83 = arith.constant 0 : index
      %172 = vector.load %arg5[%c0_82, %c0_83] : memref<5x64xf32, #tpu.memory_space<vmem>>, vector<5x64xf32>
      %173 = arith.addf %171, %172 : vector<5x64xf32>
      %c1_84 = arith.constant 1 : index
      %c0_85 = arith.constant 0 : index
      %174 = vector.load %arg4[%c1_84, %c0_85] : memref<5x64xf32, #tpu.memory_space<vmem>>, vector<1x64xf32>
      %c2_86 = arith.constant 2 : index
      %c0_87 = arith.constant 0 : index
      %175 = vector.load %arg4[%c2_86, %c0_87] : memref<5x64xf32, #tpu.memory_space<vmem>>, vector<1x64xf32>
      %cst_88 = arith.constant dense<0.000000e+00> : vector<5xf32>
      %176 = vector.multi_reduction <add>, %173, %cst_88 [1] : vector<5x64xf32> to vector<5xf32>
      %177 = vector.shape_cast %176 : vector<5xf32> to vector<5x1xf32>
      %cst_89 = arith.constant 6.400000e+01 : f32
      %178 = vector.broadcast %cst_89 : f32 to vector<5x1xf32>
      %179 = arith.divf %177, %178 : vector<5x1xf32>
      %180 = vector.broadcast %179 : vector<5x1xf32> to vector<5x64xf32>
      %181 = arith.subf %173, %180 : vector<5x64xf32>
      %182 = arith.mulf %181, %181 : vector<5x64xf32>
      %cst_90 = arith.constant dense<0.000000e+00> : vector<5xf32>
      %183 = vector.multi_reduction <add>, %182, %cst_90 [1] : vector<5x64xf32> to vector<5xf32>
      %184 = vector.shape_cast %183 : vector<5xf32> to vector<5x1xf32>
      %cst_91 = arith.constant 6.400000e+01 : f32
      %185 = vector.broadcast %cst_91 : f32 to vector<5x1xf32>
      %186 = arith.divf %184, %185 : vector<5x1xf32>
      %cst_92 = arith.constant 9.99999974E-6 : f32
      %187 = vector.broadcast %cst_92 : f32 to vector<5x1xf32>
      %188 = arith.addf %186, %187 : vector<5x1xf32>
      %189 = math.rsqrt %188 : vector<5x1xf32>
      %190 = vector.broadcast %189 : vector<5x1xf32> to vector<5x64xf32>
      %191 = arith.mulf %181, %190 : vector<5x64xf32>
      %192 = vector.broadcast %174 : vector<1x64xf32> to vector<5x64xf32>
      %193 = arith.mulf %191, %192 : vector<5x64xf32>
      %194 = vector.broadcast %175 : vector<1x64xf32> to vector<5x64xf32>
      %195 = arith.addf %193, %194 : vector<5x64xf32>
      %c0_93 = arith.constant 0 : index
      %c0_94 = arith.constant 0 : index
      %196 = vector.load %arg13[%c0_93, %c0_94] : memref<5x64xf32, #tpu.memory_space<vmem>>, vector<5x64xf32>
      tpu.vector_store %arg13[%c0_93, %c0_94], %195 {strides = array<i32>} : memref<5x64xf32, #tpu.memory_space<vmem>>, vector<5x64xf32>,
    } else {
    }
    %c0 = arith.constant 0 : index
    %c0_1 = arith.constant 0 : index
    %3 = vector.load %arg13[%c0, %c0_1] : memref<5x64xf32, #tpu.memory_space<vmem>>, vector<5x64xf32>
    %c0_2 = arith.constant 0 : index
    %c0_3 = arith.constant 0 : index
    %c0_4 = arith.constant 0 : index
    %4 = vector.load %arg6[%c0_2, %c0_3, %c0_4] : memref<1x128x256xf32, #tpu.memory_space<vmem>>, vector<1x64x192xf32>
    %5 = vector.shape_cast %4 : vector<1x64x192xf32> to vector<64x192xf32>
    %c0_5 = arith.constant 0 : index
    %c64 = arith.constant 64 : index
    %c0_6 = arith.constant 0 : index
    %6 = vector.load %arg6[%c0_5, %c64, %c0_6] : memref<1x128x256xf32, #tpu.memory_space<vmem>>, vector<1x64x256xf32>
    %7 = vector.shape_cast %6 : vector<1x64x256xf32> to vector<64x256xf32>
    %c0_7 = arith.constant 0 : index
    %c0_8 = arith.constant 0 : index
    %c0_9 = arith.constant 0 : index
    %8 = vector.load %arg7[%c0_7, %c0_8, %c0_9] : memref<1x320x64xf32, #tpu.memory_space<vmem>>, vector<1x256x64xf32>
    %9 = vector.shape_cast %8 : vector<1x256x64xf32> to vector<256x64xf32>
    %c0_10 = arith.constant 0 : index
    %c256 = arith.constant 256 : index
    %c0_11 = arith.constant 0 : index
    %10 = vector.load %arg7[%c0_10, %c256, %c0_11] : memref<1x320x64xf32, #tpu.memory_space<vmem>>, vector<1x64x64xf32>
    %11 = vector.shape_cast %10 : vector<1x64x64xf32> to vector<64x64xf32>
    %c0_12 = arith.constant 0 : index
    %c0_13 = arith.constant 0 : index
    %c0_14 = arith.constant 0 : index
    %12 = vector.load %arg8[%c0_12, %c0_13, %c0_14] : memref<1x2x256xf32, #tpu.memory_space<vmem>>, vector<1x1x192xf32>
    %13 = vector.shape_cast %12 : vector<1x1x192xf32> to vector<1x192xf32>
    %c0_15 = arith.constant 0 : index
    %c1 = arith.constant 1 : index
    %c0_16 = arith.constant 0 : index
    %14 = vector.load %arg8[%c0_15, %c1, %c0_16] : memref<1x2x256xf32, #tpu.memory_space<vmem>>, vector<1x1x256xf32>
    %15 = vector.shape_cast %14 : vector<1x1x256xf32> to vector<1x256xf32>
    %c0_17 = arith.constant 0 : index
    %c0_18 = arith.constant 0 : index
    %c0_19 = arith.constant 0 : index
    %16 = vector.load %arg9[%c0_17, %c0_18, %c0_19] : memref<1x6x64xf32, #tpu.memory_space<vmem>>, vector<1x1x64xf32>
    %17 = vector.shape_cast %16 : vector<1x1x64xf32> to vector<1x64xf32>
    %c0_20 = arith.constant 0 : index
    %c1_21 = arith.constant 1 : index
    %c0_22 = arith.constant 0 : index
    %18 = vector.load %arg9[%c0_20, %c1_21, %c0_22] : memref<1x6x64xf32, #tpu.memory_space<vmem>>, vector<1x1x64xf32>
    %19 = vector.shape_cast %18 : vector<1x1x64xf32> to vector<1x64xf32>
    %c0_23 = arith.constant 0 : index
    %c2 = arith.constant 2 : index
    %c0_24 = arith.constant 0 : index
    %20 = vector.load %arg9[%c0_23, %c2, %c0_24] : memref<1x6x64xf32, #tpu.memory_space<vmem>>, vector<1x1x64xf32>
    %21 = vector.shape_cast %20 : vector<1x1x64xf32> to vector<1x64xf32>
    %c0_25 = arith.constant 0 : index
    %c3 = arith.constant 3 : index
    %c0_26 = arith.constant 0 : index
    %22 = vector.load %arg9[%c0_25, %c3, %c0_26] : memref<1x6x64xf32, #tpu.memory_space<vmem>>, vector<1x1x64xf32>
    %23 = vector.shape_cast %22 : vector<1x1x64xf32> to vector<1x64xf32>
    %c0_27 = arith.constant 0 : index
    %c4 = arith.constant 4 : index
    %c0_28 = arith.constant 0 : index
    %24 = vector.load %arg9[%c0_27, %c4, %c0_28] : memref<1x6x64xf32, #tpu.memory_space<vmem>>, vector<1x1x64xf32>
    %25 = vector.shape_cast %24 : vector<1x1x64xf32> to vector<1x64xf32>
    %c0_29 = arith.constant 0 : index
    %c5 = arith.constant 5 : index
    %c0_30 = arith.constant 0 : index
    %26 = vector.load %arg9[%c0_29, %c5, %c0_30] : memref<1x6x64xf32, #tpu.memory_space<vmem>>, vector<1x1x64xf32>
    %27 = vector.shape_cast %26 : vector<1x1x64xf32> to vector<1x64xf32>
    %cst = arith.constant dense<0.000000e+00> : vector<5xf32>
    %28 = vector.multi_reduction <add>, %3, %cst [1] : vector<5x64xf32> to vector<5xf32>
    %29 = vector.shape_cast %28 : vector<5xf32> to vector<5x1xf32>
    %cst_31 = arith.constant 6.400000e+01 : f32
    %30 = vector.broadcast %cst_31 : f32 to vector<5x1xf32>
    %31 = arith.divf %29, %30 : vector<5x1xf32>
    %32 = vector.broadcast %31 : vector<5x1xf32> to vector<5x64xf32>
    %33 = arith.subf %3, %32 : vector<5x64xf32>
    %34 = arith.mulf %33, %33 : vector<5x64xf32>
    %cst_32 = arith.constant dense<0.000000e+00> : vector<5xf32>
    %35 = vector.multi_reduction <add>, %34, %cst_32 [1] : vector<5x64xf32> to vector<5xf32>
    %36 = vector.shape_cast %35 : vector<5xf32> to vector<5x1xf32>
    %cst_33 = arith.constant 6.400000e+01 : f32
    %37 = vector.broadcast %cst_33 : f32 to vector<5x1xf32>
    %38 = arith.divf %36, %37 : vector<5x1xf32>
    %cst_34 = arith.constant 9.99999974E-6 : f32
    %39 = vector.broadcast %cst_34 : f32 to vector<5x1xf32>
    %40 = arith.addf %38, %39 : vector<5x1xf32>
    %41 = math.rsqrt %40 : vector<5x1xf32>
    %42 = vector.broadcast %41 : vector<5x1xf32> to vector<5x64xf32>
    %43 = arith.mulf %33, %42 : vector<5x64xf32>
    %44 = vector.broadcast %17 : vector<1x64xf32> to vector<5x64xf32>
    %45 = arith.mulf %43, %44 : vector<5x64xf32>
    %46 = vector.broadcast %19 : vector<1x64xf32> to vector<5x64xf32>
    %47 = arith.addf %45, %46 : vector<5x64xf32>
    %cst_35 = arith.constant dense<0.000000e+00> : vector<5x192xf32>
    %48 = tpu.matmul %47, %5, %cst_35 {dimension_numbers = #tpu.dot_dimension_numbers<[1], [0], [0], [1], [0, 0, 1, 1], [], []>} : vector<5x64xf32>, vector<64x192xf32>, vector<5x192xf32> -> vector<5x192xf32>
    %49 = vector.broadcast %13 : vector<1x192xf32> to vector<5x192xf32>
    %50 = arith.addf %48, %49 : vector<5x192xf32>
    %51 = vector.extract_strided_slice %50 {offsets = [0, 0], sizes = [5, 16], strides = [1, 1]} : vector<5x192xf32> to vector<5x16xf32>
    %52 = vector.extract_strided_slice %50 {offsets = [0, 64], sizes = [5, 16], strides = [1, 1]} : vector<5x192xf32> to vector<5x16xf32>
    %53 = vector.extract_strided_slice %50 {offsets = [0, 128], sizes = [5, 16], strides = [1, 1]} : vector<5x192xf32> to vector<5x16xf32>
    %cst_36 = arith.constant dense<0.000000e+00> : vector<5x5xf32>
    %54 = tpu.matmul %51, %52, %cst_36 {dimension_numbers = #tpu.dot_dimension_numbers<[1], [1], [0], [0], [0, 0, 1, 0], [], []>} : vector<5x16xf32>, vector<5x16xf32>, vector<5x5xf32> -> vector<5x5xf32>
    %cst_37 = arith.constant dense<0xFF800000> : vector<5xf32>
    %55 = vector.multi_reduction <maximumf>, %54, %cst_37 [1] : vector<5x5xf32> to vector<5xf32>
    %56 = vector.shape_cast %55 : vector<5xf32> to vector<5x1xf32>
    %57 = vector.broadcast %56 : vector<5x1xf32> to vector<5x5xf32>
    %58 = arith.subf %54, %57 : vector<5x5xf32>
    %59 = math.exp %58 : vector<5x5xf32>
    %cst_38 = arith.constant dense<0.000000e+00> : vector<5xf32>
    %60 = vector.multi_reduction <add>, %59, %cst_38 [1] : vector<5x5xf32> to vector<5xf32>
    %61 = vector.shape_cast %60 : vector<5xf32> to vector<5x1xf32>
    %62 = tpu.reciprocal %61 {approx = true} : vector<5x1xf32> -> vector<5x1xf32>
    %63 = vector.broadcast %62 : vector<5x1xf32> to vector<5x5xf32>
    %64 = arith.mulf %59, %63 : vector<5x5xf32>
    %cst_39 = arith.constant dense<0.000000e+00> : vector<5x16xf32>
    %65 = tpu.matmul %64, %53, %cst_39 {dimension_numbers = #tpu.dot_dimension_numbers<[1], [0], [0], [1], [0, 0, 1, 1], [], []>} : vector<5x5xf32>, vector<5x16xf32>, vector<5x16xf32> -> vector<5x16xf32>
    %66 = vector.extract_strided_slice %50 {offsets = [0, 16], sizes = [5, 16], strides = [1, 1]} : vector<5x192xf32> to vector<5x16xf32>
    %67 = vector.extract_strided_slice %50 {offsets = [0, 80], sizes = [5, 16], strides = [1, 1]} : vector<5x192xf32> to vector<5x16xf32>
    %68 = vector.extract_strided_slice %50 {offsets = [0, 144], sizes = [5, 16], strides = [1, 1]} : vector<5x192xf32> to vector<5x16xf32>
    %cst_40 = arith.constant dense<0.000000e+00> : vector<5x5xf32>
    %69 = tpu.matmul %66, %67, %cst_40 {dimension_numbers = #tpu.dot_dimension_numbers<[1], [1], [0], [0], [0, 0, 1, 0], [], []>} : vector<5x16xf32>, vector<5x16xf32>, vector<5x5xf32> -> vector<5x5xf32>
    %cst_41 = arith.constant dense<0xFF800000> : vector<5xf32>
    %70 = vector.multi_reduction <maximumf>, %69, %cst_41 [1] : vector<5x5xf32> to vector<5xf32>
    %71 = vector.shape_cast %70 : vector<5xf32> to vector<5x1xf32>
    %72 = vector.broadcast %71 : vector<5x1xf32> to vector<5x5xf32>
    %73 = arith.subf %69, %72 : vector<5x5xf32>
    %74 = math.exp %73 : vector<5x5xf32>
    %cst_42 = arith.constant dense<0.000000e+00> : vector<5xf32>
    %75 = vector.multi_reduction <add>, %74, %cst_42 [1] : vector<5x5xf32> to vector<5xf32>
    %76 = vector.shape_cast %75 : vector<5xf32> to vector<5x1xf32>
    %77 = tpu.reciprocal %76 {approx = true} : vector<5x1xf32> -> vector<5x1xf32>
    %78 = vector.broadcast %77 : vector<5x1xf32> to vector<5x5xf32>
    %79 = arith.mulf %74, %78 : vector<5x5xf32>
    %cst_43 = arith.constant dense<0.000000e+00> : vector<5x16xf32>
    %80 = tpu.matmul %79, %68, %cst_43 {dimension_numbers = #tpu.dot_dimension_numbers<[1], [0], [0], [1], [0, 0, 1, 1], [], []>} : vector<5x5xf32>, vector<5x16xf32>, vector<5x16xf32> -> vector<5x16xf32>
    %81 = vector.extract_strided_slice %50 {offsets = [0, 32], sizes = [5, 16], strides = [1, 1]} : vector<5x192xf32> to vector<5x16xf32>
    %82 = vector.extract_strided_slice %50 {offsets = [0, 96], sizes = [5, 16], strides = [1, 1]} : vector<5x192xf32> to vector<5x16xf32>
    %83 = vector.extract_strided_slice %50 {offsets = [0, 160], sizes = [5, 16], strides = [1, 1]} : vector<5x192xf32> to vector<5x16xf32>
    %cst_44 = arith.constant dense<0.000000e+00> : vector<5x5xf32>
    %84 = tpu.matmul %81, %82, %cst_44 {dimension_numbers = #tpu.dot_dimension_numbers<[1], [1], [0], [0], [0, 0, 1, 0], [], []>} : vector<5x16xf32>, vector<5x16xf32>, vector<5x5xf32> -> vector<5x5xf32>
    %cst_45 = arith.constant dense<0xFF800000> : vector<5xf32>
    %85 = vector.multi_reduction <maximumf>, %84, %cst_45 [1] : vector<5x5xf32> to vector<5xf32>
    %86 = vector.shape_cast %85 : vector<5xf32> to vector<5x1xf32>
    %87 = vector.broadcast %86 : vector<5x1xf32> to vector<5x5xf32>
    %88 = arith.subf %84, %87 : vector<5x5xf32>
    %89 = math.exp %88 : vector<5x5xf32>
    %cst_46 = arith.constant dense<0.000000e+00> : vector<5xf32>
    %90 = vector.multi_reduction <add>, %89, %cst_46 [1] : vector<5x5xf32> to vector<5xf32>
    %91 = vector.shape_cast %90 : vector<5xf32> to vector<5x1xf32>
    %92 = tpu.reciprocal %91 {approx = true} : vector<5x1xf32> -> vector<5x1xf32>
    %93 = vector.broadcast %92 : vector<5x1xf32> to vector<5x5xf32>
    %94 = arith.mulf %89, %93 : vector<5x5xf32>
    %cst_47 = arith.constant dense<0.000000e+00> : vector<5x16xf32>
    %95 = tpu.matmul %94, %83, %cst_47 {dimension_numbers = #tpu.dot_dimension_numbers<[1], [0], [0], [1], [0, 0, 1, 1], [], []>} : vector<5x5xf32>, vector<5x16xf32>, vector<5x16xf32> -> vector<5x16xf32>
    %96 = vector.extract_strided_slice %50 {offsets = [0, 48], sizes = [5, 16], strides = [1, 1]} : vector<5x192xf32> to vector<5x16xf32>
    %97 = vector.extract_strided_slice %50 {offsets = [0, 112], sizes = [5, 16], strides = [1, 1]} : vector<5x192xf32> to vector<5x16xf32>
    %98 = vector.extract_strided_slice %50 {offsets = [0, 176], sizes = [5, 16], strides = [1, 1]} : vector<5x192xf32> to vector<5x16xf32>
    %cst_48 = arith.constant dense<0.000000e+00> : vector<5x5xf32>
    %99 = tpu.matmul %96, %97, %cst_48 {dimension_numbers = #tpu.dot_dimension_numbers<[1], [1], [0], [0], [0, 0, 1, 0], [], []>} : vector<5x16xf32>, vector<5x16xf32>, vector<5x5xf32> -> vector<5x5xf32>
    %cst_49 = arith.constant dense<0xFF800000> : vector<5xf32>
    %100 = vector.multi_reduction <maximumf>, %99, %cst_49 [1] : vector<5x5xf32> to vector<5xf32>
    %101 = vector.shape_cast %100 : vector<5xf32> to vector<5x1xf32>
    %102 = vector.broadcast %101 : vector<5x1xf32> to vector<5x5xf32>
    %103 = arith.subf %99, %102 : vector<5x5xf32>
    %104 = math.exp %103 : vector<5x5xf32>
    %cst_50 = arith.constant dense<0.000000e+00> : vector<5xf32>
    %105 = vector.multi_reduction <add>, %104, %cst_50 [1] : vector<5x5xf32> to vector<5xf32>
    %106 = vector.shape_cast %105 : vector<5xf32> to vector<5x1xf32>
    %107 = tpu.reciprocal %106 {approx = true} : vector<5x1xf32> -> vector<5x1xf32>
    %108 = vector.broadcast %107 : vector<5x1xf32> to vector<5x5xf32>
    %109 = arith.mulf %104, %108 : vector<5x5xf32>
    %cst_51 = arith.constant dense<0.000000e+00> : vector<5x16xf32>
    %110 = tpu.matmul %109, %98, %cst_51 {dimension_numbers = #tpu.dot_dimension_numbers<[1], [0], [0], [1], [0, 0, 1, 1], [], []>} : vector<5x5xf32>, vector<5x16xf32>, vector<5x16xf32> -> vector<5x16xf32>
    %111 = tpu.concatenate %65, %80, %95, %110 in 1 : vector<5x16xf32>, vector<5x16xf32>, vector<5x16xf32>, vector<5x16xf32> -> vector<5x64xf32>
    %cst_52 = arith.constant dense<0.000000e+00> : vector<5x64xf32>
    %112 = tpu.matmul %111, %11, %cst_52 {dimension_numbers = #tpu.dot_dimension_numbers<[1], [0], [0], [1], [0, 0, 1, 1], [], []>} : vector<5x64xf32>, vector<64x64xf32>, vector<5x64xf32> -> vector<5x64xf32>
    %113 = vector.broadcast %21 : vector<1x64xf32> to vector<5x64xf32>
    %114 = arith.addf %112, %113 : vector<5x64xf32>
    %115 = arith.addf %3, %114 : vector<5x64xf32>
    %cst_53 = arith.constant dense<0.000000e+00> : vector<5xf32>
    %116 = vector.multi_reduction <add>, %115, %cst_53 [1] : vector<5x64xf32> to vector<5xf32>
    %117 = vector.shape_cast %116 : vector<5xf32> to vector<5x1xf32>
    %cst_54 = arith.constant 6.400000e+01 : f32
    %118 = vector.broadcast %cst_54 : f32 to vector<5x1xf32>
    %119 = arith.divf %117, %118 : vector<5x1xf32>
    %120 = vector.broadcast %119 : vector<5x1xf32> to vector<5x64xf32>
    %121 = arith.subf %115, %120 : vector<5x64xf32>
    %122 = arith.mulf %121, %121 : vector<5x64xf32>
    %cst_55 = arith.constant dense<0.000000e+00> : vector<5xf32>
    %123 = vector.multi_reduction <add>, %122, %cst_55 [1] : vector<5x64xf32> to vector<5xf32>
    %124 = vector.shape_cast %123 : vector<5xf32> to vector<5x1xf32>
    %cst_56 = arith.constant 6.400000e+01 : f32
    %125 = vector.broadcast %cst_56 : f32 to vector<5x1xf32>
    %126 = arith.divf %124, %125 : vector<5x1xf32>
    %cst_57 = arith.constant 9.99999974E-6 : f32
    %127 = vector.broadcast %cst_57 : f32 to vector<5x1xf32>
    %128 = arith.addf %126, %127 : vector<5x1xf32>
    %129 = math.rsqrt %128 : vector<5x1xf32>
    %130 = vector.broadcast %129 : vector<5x1xf32> to vector<5x64xf32>
    %131 = arith.mulf %121, %130 : vector<5x64xf32>
    %132 = vector.broadcast %23 : vector<1x64xf32> to vector<5x64xf32>
    %133 = arith.mulf %131, %132 : vector<5x64xf32>
    %134 = vector.broadcast %25 : vector<1x64xf32> to vector<5x64xf32>
    %135 = arith.addf %133, %134 : vector<5x64xf32>
    %cst_58 = arith.constant dense<0.000000e+00> : vector<5x256xf32>
    %136 = tpu.matmul %135, %7, %cst_58 {dimension_numbers = #tpu.dot_dimension_numbers<[1], [0], [0], [1], [0, 0, 1, 1], [], []>} : vector<5x64xf32>, vector<64x256xf32>, vector<5x256xf32> -> vector<5x256xf32>
    %137 = vector.broadcast %15 : vector<1x256xf32> to vector<5x256xf32>
    %138 = arith.addf %136, %137 : vector<5x256xf32>
    %cst_59 = arith.constant 1.702000e+00 : f32
    %139 = vector.broadcast %cst_59 : f32 to vector<5x256xf32>
    %140 = arith.mulf %139, %138 : vector<5x256xf32>
    %141 = arith.negf %140 : vector<5x256xf32>
    %142 = math.exp %141 : vector<5x256xf32>
    %cst_60 = arith.constant 1.000000e+00 : f32
    %143 = vector.broadcast %cst_60 : f32 to vector<5x256xf32>
    %144 = arith.addf %143, %142 : vector<5x256xf32>
    %145 = arith.divf %143, %144 : vector<5x256xf32>
    %146 = arith.mulf %138, %145 : vector<5x256xf32>
    %cst_61 = arith.constant dense<0.000000e+00> : vector<5x64xf32>
    %147 = tpu.matmul %146, %9, %cst_61 {dimension_numbers = #tpu.dot_dimension_numbers<[1], [0], [0], [1], [0, 0, 1, 1], [], []>} : vector<5x256xf32>, vector<256x64xf32>, vector<5x64xf32> -> vector<5x64xf32>
    %148 = vector.broadcast %27 : vector<1x64xf32> to vector<5x64xf32>
    %149 = arith.addf %147, %148 : vector<5x64xf32>
    %150 = arith.addf %115, %149 : vector<5x64xf32>
    %c0_62 = arith.constant 0 : index
    %c0_63 = arith.constant 0 : index
    %151 = vector.load %arg13[%c0_62, %c0_63] : memref<5x64xf32, #tpu.memory_space<vmem>>, vector<5x64xf32>
    tpu.vector_store %arg13[%c0_62, %c0_63], %150 {strides = array<i32>} : memref<5x64xf32, #tpu.memory_space<vmem>>, vector<5x64xf32>,
    %c6_i32 = arith.constant 6 : i32
    %152 = arith.cmpi eq, %arg1, %c6_i32 : i32
    %153 = arith.extui %152 : i1 to i32
    %c0_i32_64 = arith.constant 0 : i32
    %154 = arith.cmpi ne, %153, %c0_i32_64 : i32
    scf.if %154 {
      %164 = vector.extract_strided_slice %150 {offsets = [1, 0], sizes = [4, 64], strides = [1, 1]} : vector<5x64xf32> to vector<4x64xf32>
      %165 = arith.mulf %164, %164 : vector<4x64xf32>
      %cst_68 = arith.constant dense<0.000000e+00> : vector<4xf32>
      %166 = vector.multi_reduction <add>, %165, %cst_68 [1] : vector<4x64xf32> to vector<4xf32>
      %167 = vector.shape_cast %166 : vector<4xf32> to vector<4x1xf32>
      %168 = math.rsqrt %167 : vector<4x1xf32>
      %169 = vector.broadcast %168 : vector<4x1xf32> to vector<4x64xf32>
      %170 = arith.mulf %164, %169 : vector<4x64xf32>
      %c0_69 = arith.constant 0 : index
      %c0_70 = arith.constant 0 : index
      %c0_71 = arith.constant 0 : index
      %c0_72 = arith.constant 0 : index
      %171 = vector.load %arg11[%c0_69, %c0_70, %c0_71, %c0_72] : memref<1x3x4x64xf32, #tpu.memory_space<vmem>>, vector<1x1x4x64xf32>
      %172 = vector.shape_cast %171 : vector<1x1x4x64xf32> to vector<4x64xf32>
      %173 = vector.shape_cast %170 : vector<4x64xf32> to vector<1x1x4x64xf32>
      tpu.vector_store %arg11[%c0_69, %c0_70, %c0_71, %c0_72], %173 {strides = array<i32>} : memref<1x3x4x64xf32, #tpu.memory_space<vmem>>, vector<1x1x4x64xf32>,
    } else {
    }
    %c7_i32 = arith.constant 7 : i32
    %155 = arith.cmpi eq, %arg1, %c7_i32 : i32
    %156 = arith.extui %155 : i1 to i32
    %c0_i32_65 = arith.constant 0 : i32
    %157 = arith.cmpi ne, %156, %c0_i32_65 : i32
    scf.if %157 {
      %164 = vector.extract_strided_slice %150 {offsets = [1, 0], sizes = [4, 64], strides = [1, 1]} : vector<5x64xf32> to vector<4x64xf32>
      %165 = arith.mulf %164, %164 : vector<4x64xf32>
      %cst_68 = arith.constant dense<0.000000e+00> : vector<4xf32>
      %166 = vector.multi_reduction <add>, %165, %cst_68 [1] : vector<4x64xf32> to vector<4xf32>
      %167 = vector.shape_cast %166 : vector<4xf32> to vector<4x1xf32>
      %168 = math.rsqrt %167 : vector<4x1xf32>
      %169 = vector.broadcast %168 : vector<4x1xf32> to vector<4x64xf32>
      %170 = arith.mulf %164, %169 : vector<4x64xf32>
      %c0_69 = arith.constant 0 : index
      %c1_70 = arith.constant 1 : index
      %c0_71 = arith.constant 0 : index
      %c0_72 = arith.constant 0 : index
      %171 = vector.load %arg11[%c0_69, %c1_70, %c0_71, %c0_72] : memref<1x3x4x64xf32, #tpu.memory_space<vmem>>, vector<1x1x4x64xf32>
      %172 = vector.shape_cast %171 : vector<1x1x4x64xf32> to vector<4x64xf32>
      %173 = vector.shape_cast %170 : vector<4x64xf32> to vector<1x1x4x64xf32>
      tpu.vector_store %arg11[%c0_69, %c1_70, %c0_71, %c0_72], %173 {strides = array<i32>} : memref<1x3x4x64xf32, #tpu.memory_space<vmem>>, vector<1x1x4x64xf32>,
    } else {
    }
    %c8_i32 = arith.constant 8 : i32
    %158 = arith.cmpi eq, %arg1, %c8_i32 : i32
    %159 = arith.extui %158 : i1 to i32
    %c0_i32_66 = arith.constant 0 : i32
    %160 = arith.cmpi ne, %159, %c0_i32_66 : i32
    scf.if %160 {
      %164 = vector.extract_strided_slice %150 {offsets = [1, 0], sizes = [4, 64], strides = [1, 1]} : vector<5x64xf32> to vector<4x64xf32>
      %165 = arith.mulf %164, %164 : vector<4x64xf32>
      %cst_68 = arith.constant dense<0.000000e+00> : vector<4xf32>
      %166 = vector.multi_reduction <add>, %165, %cst_68 [1] : vector<4x64xf32> to vector<4xf32>
      %167 = vector.shape_cast %166 : vector<4xf32> to vector<4x1xf32>
      %168 = math.rsqrt %167 : vector<4x1xf32>
      %169 = vector.broadcast %168 : vector<4x1xf32> to vector<4x64xf32>
      %170 = arith.mulf %164, %169 : vector<4x64xf32>
      %c0_69 = arith.constant 0 : index
      %c2_70 = arith.constant 2 : index
      %c0_71 = arith.constant 0 : index
      %c0_72 = arith.constant 0 : index
      %171 = vector.load %arg11[%c0_69, %c2_70, %c0_71, %c0_72] : memref<1x3x4x64xf32, #tpu.memory_space<vmem>>, vector<1x1x4x64xf32>
      %172 = vector.shape_cast %171 : vector<1x1x4x64xf32> to vector<4x64xf32>
      %173 = vector.shape_cast %170 : vector<4x64xf32> to vector<1x1x4x64xf32>
      tpu.vector_store %arg11[%c0_69, %c2_70, %c0_71, %c0_72], %173 {strides = array<i32>} : memref<1x3x4x64xf32, #tpu.memory_space<vmem>>, vector<1x1x4x64xf32>,
    } else {
    }
    %c11_i32 = arith.constant 11 : i32
    %161 = arith.cmpi eq, %arg1, %c11_i32 : i32
    %162 = arith.extui %161 : i1 to i32
    %c0_i32_67 = arith.constant 0 : i32
    %163 = arith.cmpi ne, %162, %c0_i32_67 : i32
    scf.if %163 {
      %164 = vector.extract_strided_slice %150 {offsets = [1, 0], sizes = [4, 64], strides = [1, 1]} : vector<5x64xf32> to vector<4x64xf32>
      %c3_68 = arith.constant 3 : index
      %c0_69 = arith.constant 0 : index
      %165 = vector.load %arg4[%c3_68, %c0_69] : memref<5x64xf32, #tpu.memory_space<vmem>>, vector<1x64xf32>
      %c4_70 = arith.constant 4 : index
      %c0_71 = arith.constant 0 : index
      %166 = vector.load %arg4[%c4_70, %c0_71] : memref<5x64xf32, #tpu.memory_space<vmem>>, vector<1x64xf32>
      %cst_72 = arith.constant dense<0.000000e+00> : vector<4xf32>
      %167 = vector.multi_reduction <add>, %164, %cst_72 [1] : vector<4x64xf32> to vector<4xf32>
      %168 = vector.shape_cast %167 : vector<4xf32> to vector<4x1xf32>
      %cst_73 = arith.constant 6.400000e+01 : f32
      %169 = vector.broadcast %cst_73 : f32 to vector<4x1xf32>
      %170 = arith.divf %168, %169 : vector<4x1xf32>
      %171 = vector.broadcast %170 : vector<4x1xf32> to vector<4x64xf32>
      %172 = arith.subf %164, %171 : vector<4x64xf32>
      %173 = arith.mulf %172, %172 : vector<4x64xf32>
      %cst_74 = arith.constant dense<0.000000e+00> : vector<4xf32>
      %174 = vector.multi_reduction <add>, %173, %cst_74 [1] : vector<4x64xf32> to vector<4xf32>
      %175 = vector.shape_cast %174 : vector<4xf32> to vector<4x1xf32>
      %cst_75 = arith.constant 6.400000e+01 : f32
      %176 = vector.broadcast %cst_75 : f32 to vector<4x1xf32>
      %177 = arith.divf %175, %176 : vector<4x1xf32>
      %cst_76 = arith.constant 9.99999974E-6 : f32
      %178 = vector.broadcast %cst_76 : f32 to vector<4x1xf32>
      %179 = arith.addf %177, %178 : vector<4x1xf32>
      %180 = math.rsqrt %179 : vector<4x1xf32>
      %181 = vector.broadcast %180 : vector<4x1xf32> to vector<4x64xf32>
      %182 = arith.mulf %172, %181 : vector<4x64xf32>
      %183 = vector.broadcast %165 : vector<1x64xf32> to vector<4x64xf32>
      %184 = arith.mulf %182, %183 : vector<4x64xf32>
      %185 = vector.broadcast %166 : vector<1x64xf32> to vector<4x64xf32>
      %186 = arith.addf %184, %185 : vector<4x64xf32>
      %c0_77 = arith.constant 0 : index
      %c0_78 = arith.constant 0 : index
      %187 = vector.load %arg10[%c0_77, %c0_78] : memref<64x32xf32, #tpu.memory_space<vmem>>, vector<64x32xf32>
      %cst_79 = arith.constant dense<0.000000e+00> : vector<4x32xf32>
      %188 = tpu.matmul %186, %187, %cst_79 {dimension_numbers = #tpu.dot_dimension_numbers<[1], [0], [0], [1], [0, 0, 1, 1], [], []>} : vector<4x64xf32>, vector<64x32xf32>, vector<4x32xf32> -> vector<4x32xf32>
      %189 = arith.mulf %188, %188 : vector<4x32xf32>
      %cst_80 = arith.constant dense<0.000000e+00> : vector<4xf32>
      %190 = vector.multi_reduction <add>, %189, %cst_80 [1] : vector<4x32xf32> to vector<4xf32>
      %191 = vector.shape_cast %190 : vector<4xf32> to vector<4x1xf32>
      %192 = math.rsqrt %191 : vector<4x1xf32>
      %193 = vector.broadcast %192 : vector<4x1xf32> to vector<4x32xf32>
      %194 = arith.mulf %188, %193 : vector<4x32xf32>
      %c0_81 = arith.constant 0 : index
      %c0_82 = arith.constant 0 : index
      %c0_83 = arith.constant 0 : index
      %195 = vector.load %arg12[%c0_81, %c0_82, %c0_83] : memref<1x4x32xf32, #tpu.memory_space<vmem>>, vector<1x4x32xf32>
      %196 = vector.shape_cast %195 : vector<1x4x32xf32> to vector<4x32xf32>
      %197 = vector.shape_cast %194 : vector<4x32xf32> to vector<1x4x32xf32>
      tpu.vector_store %arg12[%c0_81, %c0_82, %c0_83], %197 {strides = array<i32>} : memref<1x4x32xf32, #tpu.memory_space<vmem>>, vector<1x4x32xf32>,
    } else {
    }
    return
  }
  func.func @transform_0(%arg0: i32, %arg1: i32) -> (i32, i32, i32) {
    %c0_i32 = arith.constant 0 : i32
    %c0_i32_0 = arith.constant 0 : i32
    %c0_i32_1 = arith.constant 0 : i32
    return %arg0, %c0_i32, %c0_i32_0 : i32, i32, i32
  }
  func.func @transform_1(%arg0: i32, %arg1: i32) -> (i32, i32) {
    %c0_i32 = arith.constant 0 : i32
    %c0_i32_0 = arith.constant 0 : i32
    %c0_i32_1 = arith.constant 0 : i32
    return %c0_i32, %c0_i32_0 : i32, i32
  }
  func.func @transform_2(%arg0: i32, %arg1: i32) -> (i32, i32) {
    %c0_i32 = arith.constant 0 : i32
    %c0_i32_0 = arith.constant 0 : i32
    %c0_i32_1 = arith.constant 0 : i32
    return %c0_i32, %c0_i32_0 : i32, i32
  }
  func.func @transform_3(%arg0: i32, %arg1: i32) -> (i32, i32) {
    %c0_i32 = arith.constant 0 : i32
    %c0_i32_0 = arith.constant 0 : i32
    %c0_i32_1 = arith.constant 0 : i32
    return %c0_i32, %c0_i32_0 : i32, i32
  }
  func.func @transform_4(%arg0: i32, %arg1: i32) -> (i32, i32, i32) {
    %c0_i32 = arith.constant 0 : i32
    %c0_i32_0 = arith.constant 0 : i32
    %c0_i32_1 = arith.constant 0 : i32
    return %arg1, %c0_i32, %c0_i32_0 : i32, i32, i32
  }
  func.func @transform_5(%arg0: i32, %arg1: i32) -> (i32, i32, i32) {
    %c0_i32 = arith.constant 0 : i32
    %c0_i32_0 = arith.constant 0 : i32
    %c0_i32_1 = arith.constant 0 : i32
    return %arg1, %c0_i32, %c0_i32_0 : i32, i32, i32
  }
  func.func @transform_6(%arg0: i32, %arg1: i32) -> (i32, i32, i32) {
    %c0_i32 = arith.constant 0 : i32
    %c0_i32_0 = arith.constant 0 : i32
    %c0_i32_1 = arith.constant 0 : i32
    return %arg1, %c0_i32, %c0_i32_0 : i32, i32, i32
  }
  func.func @transform_7(%arg0: i32, %arg1: i32) -> (i32, i32, i32) {
    %c0_i32 = arith.constant 0 : i32
    %c0_i32_0 = arith.constant 0 : i32
    %c0_i32_1 = arith.constant 0 : i32
    return %arg1, %c0_i32, %c0_i32_0 : i32, i32, i32
  }
  func.func @transform_8(%arg0: i32, %arg1: i32) -> (i32, i32) {
    %c0_i32 = arith.constant 0 : i32
    %c0_i32_0 = arith.constant 0 : i32
    %c0_i32_1 = arith.constant 0 : i32
    return %c0_i32, %c0_i32_0 : i32, i32
  }
  func.func @transform_9(%arg0: i32, %arg1: i32) -> (i32, i32, i32, i32) {
    %c0_i32 = arith.constant 0 : i32
    %c0_i32_0 = arith.constant 0 : i32
    %c0_i32_1 = arith.constant 0 : i32
    %c0_i32_2 = arith.constant 0 : i32
    return %arg0, %c0_i32, %c0_i32_0, %c0_i32_1 : i32, i32, i32, i32
  }
  func.func @transform_10(%arg0: i32, %arg1: i32) -> (i32, i32, i32) {
    %c0_i32 = arith.constant 0 : i32
    %c0_i32_0 = arith.constant 0 : i32
    %c0_i32_1 = arith.constant 0 : i32
    return %arg0, %c0_i32, %c0_i32_0 : i32, i32, i32
  }
}

</mosaic_0001>

<bundles_post_ra>
// kernel: vit_forward.1
= control target key start
LH: loop header
LB: loop body
LE: loop exit
PB: predicated region body
PF: predicated region fallthrough
CT: control target
= control target key end

     0   :  { %s2721_s0 = inlined_call_operand.vmem [shape: f32[2,4,768], index: 0, kind: input, shape index: {}]   ;;  %s2722_s1 = inlined_call_operand.vmem [shape: f32[768,64], index: 1, kind: input, shape index: {}]   ;;  %s2723_s2 = inlined_call_operand.vmem [shape: f32[5,64], index: 2, kind: input, shape index: {}]   ;;  %s2724_s3 = inlined_call_operand.vmem [shape: f32[5,64], index: 3, kind: input, shape index: {}]   ;;  %s2725_s4 = inlined_call_operand.vmem [shape: f32[12,128,256], index: 4, kind: input, shape index: {}]   ;;  %s2726_s5 = inlined_call_operand.vmem [shape: f32[12,320,64], index: 5, kind: input, shape index: {}]   ;;  %s2727_s6 = inlined_call_operand.vmem [shape: f32[12,2,256], index: 6, kind: input, shape index: {}]   ;;  %s2728_s7 = inlined_call_operand.vmem [shape: f32[12,6,64], index: 7, kind: input, shape index: {}]   ;;  %s2729_s8 = inlined_call_operand.vmem [shape: f32[64,32], index: 8, kind: input, shape index: {}]   ;;  %s2730_s9 = inlined_call_operand.vmem [shape: f32[2,3,4,64], index: 9, kind: output, shape index: {0}]   ;;  %s2731_s10 = inlined_call_operand.hbm [shape: f32[2,4,32], index: 10, kind: output, shape index: {1}]  }
   0x1   :  { %2746 = sst [smem:[#allocation18_spill]] %s2721_s0 }
   0x2   :  { %2747 = sst [smem:[#allocation19_spill]] %s2731_s10 }
   0x3   :  { %16 = vsyncpa [#allocation4], 0 }
   0x4   :  { %18 = vsyncpa [#allocation4 + $0x1], 0  ;;  %s2043_s13 = smov 0   ;;  %s2045_s14 = smov 0  }
   0x5   :  { %s2047_s15 = smov 0   ;;  %s2049_s16 = smov 0  }
   0x6   :  { %s2051_s17 = smov 0   ;;  %s2053_s18 = smov 0  }
   0x7   :  { %s2055_s19 = smov 0   ;;  %s2057_s20 = smov 0  }
   0x8 LB: > { %2748 = sst [smem:[#allocation6_spill]] %s1949_s13  ;;  %s1694_s21 = sadd.s32 4294967295, %s1977_s20   ;;  %s1977_s20 = sphi %s2057_s20, %s24_s20   ;;  %s1973_s19 = sphi %s2055_s19, %s2777_s19   ;;  %s1969_s18 = sphi %s2053_s18, %s2776_s18   ;;  %s1965_s17 = sphi %s2051_s17, %s2775_s17   ;;  %s1961_s16 = sphi %s2049_s16, %s2774_s16   ;;  %s1957_s15 = sphi %s2047_s15, %s2773_s15   ;;  %s1953_s14 = sphi %s2045_s14, %s2772_s14   ;;  %s1949_s13 = sphi %s2043_s13, %s2771_s13  }
   0x9   : > { %2749 = sst [smem:[#allocation7_spill]] %s1953_s14  ;;  %s1695_s22 = sadd.s32 4294967294, %s1977_s20  }
   0xa   : > { %2750 = sst [smem:[#allocation8_spill]] %s1957_s15  ;;  %s33_s23 = sadd.s32 1, %s1969_s18 }
   0xb   : > { %2751 = sst [smem:[#allocation9_spill]] %s1965_s17  ;;  %p34_p0 = scmp.ge.s32.totalorder %s33_s23, 12 }
   0xc   : > { %2752 = sst [smem:[#allocation10_spill]] %s1969_s18  ;;  %s36_s24 = sadd.s32 1, %s1973_s19 }
   0xd   : > { %2753 = sst [smem:[#allocation11_spill]] %s1973_s19  ;;  %p293_p1 = scmp.ne.s32.totalorder %s1957_s15, %s1953_s14 }
   0xe   : > { %2754 = sst [smem:[#allocation12_spill]] %s1977_s20  ;;  %p294_p2 = scmp.eq.s32.totalorder %s1694_s21, 23 }
   0xf   : > { %s2779_s23 = smov (%p34_p0, %s33_s23), 0  ;;  %s2781_s24 = smov (!%p34_p0, %s36_s24), %s1973_s19 }
  0x10   : > { %2755 = sst [smem:[#allocation13_spill]] %s2779_s23  ;;  %p2092_p3 = por %p294_p2, %p293_p1 }
  0x11   : > { %p299_p4 = scmp.ne.s32.totalorder %s1953_s14, %s1949_s13  ;;  %p38_p5 = scmp.ge.s32.totalorder %s2781_s24, 2 }
  0x12   : > { %s2756_s25 = scalar_select %p2092_p3, 1, 0 }
  0x13   : > { %p300_p6 = scmp.eq.s32.totalorder %s1695_s22, 23  ;;  %p1698_p7 = scmp.ge.s32.totalorder %s1977_s20, 1 }
  0x14   : > { %2757 = sst [smem:[#allocation14_spill]] %s2756_s25  ;;  %p369_p8 = scmp.lt.s32.totalorder %s1977_s20, 25 }
  0x15   : > { %s2783_s24 = smov (%p38_p5, %s2781_s24), 0  ;;  %p2102_p9 = por %p300_p6, %p299_p4 }
  0x16   : > { %2758 = sst [smem:[#allocation15_spill]] %s2783_s24  ;;  %p370_p10 = pnand %p1698_p7, %p369_p8 }
  0x17   : > { %s2759_s26 = scalar_select %p2102_p9, 1, 0 }
  0x18   : > { %s280_s27 = ssub.s32 %s1973_s19, %s2783_s24  ;;  %s283_s28 = sadd.s32 1, %s1957_s15 }
  0x19   : > { %2760 = sst [smem:[#allocation16_spill]] %s2759_s26  ;;  %p281_p11 = scmp.eq.s32.totalorder %s280_s27, 0 }
  0x1a   : > { %373 = sbr.rel (%p370_p10) target bundleno = 3803 (0xedb), region = 56  ;;  %s2737_s30 = sand.u32 (!%p370_p10), 1, %s1953_s14  }
  0x1b   : > { %s2110_s29 = scalar_select %p281_p11, %s1957_s15, %s283_s28  }
  0x1c   : > { %p431_p12 = scmp.lt.s32.totalorder (!%p370_p10), %s1965_s17, 1  ;;  %s2116_s11 = sshll.u32 (!%p370_p10), %s2737_s30, 2 }
  0x1d   : > { %2761 = sst [smem:[#allocation17_spill]] %s2110_s29  ;;  %p436_p13 = scmp.lt.s32.totalorder (!%p370_p10), %s1961_s16, 11 }
  0x1e   : > { %s2762_s0 = sld [smem:[#allocation18_spill]] (!%p370_p10)  ;;  %s430_s26 = scalar_lea.vmem (!%p370_p10), [#allocation3], %s2116_s11 }
  0x1f   : > { %s432_s12 = scalar_select %p431_p12, %s1965_s17, 1 }
  0x20   : > { %s437_s21 = scalar_select %p436_p13, %s1961_s16, 11 }
  0x21   : > { %s1746_s22 = smul.u32 24, %s432_s12  ;;  %p1708_p0 = scmp.ne.s32.totalorder %s1961_s16, 0 }
  0x22   : > { %s1744_s27 = sshll.u32 %s437_s21, 8  ;;  %s1747_s28 = smul.u32 320, %s437_s21 }
  0x23   : > { %s2129_s15 = scalar_lea.vmem %s2725_s4, %s1744_s27  ;;  %s1745_s20 = sshll.u32 %s437_s21, 2 }
  0x24   : > { %s2124_s19 = scalar_lea.vmem %s2762_s0, %s1746_s22  ;;  %s2134_s13 = scalar_lea.vmem %s2726_s5, %s1747_s28 }
  0x25   : > { %s2139_s14 = scalar_lea.vmem %s2727_s6, %s1745_s20  ;;  %s1706_s17 = sshll.u32 %s437_s21, 3 }
  0x26   : > { %s2144_s22 = scalar_lea.vmem %s2728_s7, %s1706_s17  ;;  %s1748_s18 = smul.u32 12, %s432_s12 }
  0x27   : > { %463 = sbr.rel (%p1708_p0) target bundleno = 517 (0x205), region = 60 }
  0x28   : > { %s2149_s0 = scalar_lea.vmem %s2730_s9, %s1748_s18 }
  0x2c   : > { %v482_v0 = vld [vmem:[%s2722_s1 + $0x78] sm:$0xff]  ;;  %v481_v1 = vld [vmem:[%s2722_s1 + $0x70] sm:$0xff]  ;;  %v480_v4 = vld [vmem:[%s2722_s1 + $0x68] sm:$0xff]  ;;  %vm704_vm0 = vcmask 516096   ;;  %vm706_vm1 = vcmask 519168   ;;  %vm713_vm2 = vcmask 520192  }
  0x2d   : > { %v498_v2 = vld [vmem:[%s2722_s1 + $0xf8] sm:$0xff]  ;;  %583 = vmatpush.msra.mxu0 %v482_v0  ;;  %v497_v3 = vld [vmem:[%s2722_s1 + $0xf0] sm:$0xff]  ;;  %v496_v5 = vld [vmem:[%s2722_s1 + $0xe8] sm:$0xff] }
  0x2e   : > { %603 = vmatpush.msra.mxu1 %v498_v2  ;;  %v479_v6 = vld [vmem:[%s2722_s1 + $0x60] sm:$0xff]  ;;  %v478_v8 = vld [vmem:[%s2722_s1 + $0x58] sm:$0xff]  ;;  %v513_v11 = vld [vmem:[%s2722_s1 + $0x170] sm:$0xff] }
  0x2f   : > { %584 = vmatpush.msra.mxu0 %v481_v1  ;;  %v495_v7 = vld [vmem:[%s2722_s1 + $0xe0] sm:$0xff]  ;;  %v494_v9 = vld [vmem:[%s2722_s1 + $0xd8] sm:$0xff]  ;;  %v477_v13 = vld [vmem:[%s2722_s1 + $0x50] sm:$0xff] }
  0x30   : > { %604 = vmatpush.msra.mxu1 %v497_v3  ;;  %v514_v10 = vld [vmem:[%s2722_s1 + $0x178] sm:$0xff]  ;;  %v493_v14 = vld [vmem:[%s2722_s1 + $0xd0] sm:$0xff]  ;;  %v512_v15 = vld [vmem:[%s2722_s1 + $0x168] sm:$0xff] }
  0x31   : > { %585 = vmatpush.msra.mxu0 %v480_v4  ;;  %v530_v12 = vld [vmem:[%s2722_s1 + $0x1f8] sm:$0xff]  ;;  %623 = vmatpush.msra.mxu2 %v514_v10  ;;  %v529_v16 = vld [vmem:[%s2722_s1 + $0x1f0] sm:$0xff]  ;;  %v476_v17 = vld [vmem:[%s2722_s1 + $0x48] sm:$0xff] }
  0x32   : > { %605 = vmatpush.msra.mxu1 %v496_v5  ;;  %643 = vmatpush.msra.mxu3 %v530_v12  ;;  %v492_v18 = vld [vmem:[%s2722_s1 + $0xc8] sm:$0xff]  ;;  %v511_v20 = vld [vmem:[%s2722_s1 + $0x160] sm:$0xff]  ;;  %v510_v24 = vld [vmem:[%s2722_s1 + $0x158] sm:$0xff] }
  0x33   : > { %586 = vmatpush.msra.mxu0 %v479_v6  ;;  %624 = vmatpush.msra.mxu2 %v513_v11  ;;  %v528_v19 = vld [vmem:[%s2722_s1 + $0x1e8] sm:$0xff]  ;;  %v527_v21 = vld [vmem:[%s2722_s1 + $0x1e0] sm:$0xff]  ;;  %v526_v25 = vld [vmem:[%s2722_s1 + $0x1d8] sm:$0xff] }
  0x34   : > { %606 = vmatpush.msra.mxu1 %v495_v7  ;;  %644 = vmatpush.msra.mxu3 %v529_v16  ;;  %v475_v22 = vld [vmem:[%s2722_s1 + $0x40] sm:$0xff]  ;;  %v474_v26 = vld [vmem:[%s2722_s1 + $0x38] sm:$0xff]  ;;  %v509_v28 = vld [vmem:[%s2722_s1 + $0x150] sm:$0xff] }
  0x35   : > { %587 = vmatpush.msra.mxu0 %v478_v8  ;;  %v491_v23 = vld [vmem:[%s2722_s1 + $0xc0] sm:$0xff]  ;;  %625 = vmatpush.msra.mxu2 %v512_v15  ;;  %v490_v27 = vld [vmem:[%s2722_s1 + $0xb8] sm:$0xff]  ;;  %v525_v29 = vld [vmem:[%s2722_s1 + $0x1d0] sm:$0xff] }
  0x36   : > { %607 = vmatpush.msra.mxu1 %v494_v9  ;;  %645 = vmatpush.msra.mxu3 %v528_v19  ;;  %v473_v30 = vld [vmem:[%s2722_s1 + $0x30] sm:$0xff]  ;;  %v508_v32 = vld [vmem:[%s2722_s1 + $0x148] sm:$0xff]  ;;  %v507_v36 = vld [vmem:[%s2722_s1 + $0x140] sm:$0xff] }
  0x37   : > { %588 = vmatpush.msra.mxu0 %v477_v13  ;;  %626 = vmatpush.msra.mxu2 %v511_v20  ;;  %v489_v31 = vld [vmem:[%s2722_s1 + $0xb0] sm:$0xff]  ;;  %v524_v33 = vld [vmem:[%s2722_s1 + $0x1c8] sm:$0xff]  ;;  %v523_v37 = vld [vmem:[%s2722_s1 + $0x1c0] sm:$0xff] }
  0x38   : > { %608 = vmatpush.msra.mxu1 %v493_v14  ;;  %646 = vmatpush.msra.mxu3 %v527_v21  ;;  %v472_v34 = vld [vmem:[%s2722_s1 + $0x28] sm:$0xff]  ;;  %v471_v38 = vld [vmem:[%s2722_s1 + $0x20] sm:$0xff]  ;;  %v506_v40 = vld [vmem:[%s2722_s1 + $0x138] sm:$0xff] }
  0x39   : > { %589 = vmatpush.msra.mxu0 %v476_v17  ;;  %627 = vmatpush.msra.mxu2 %v510_v24  ;;  %v488_v35 = vld [vmem:[%s2722_s1 + $0xa8] sm:$0xff]  ;;  %v487_v39 = vld [vmem:[%s2722_s1 + $0xa0] sm:$0xff]  ;;  %v522_v41 = vld [vmem:[%s2722_s1 + $0x1b8] sm:$0xff] }
  0x3a   : > { %609 = vmatpush.msra.mxu1 %v492_v18  ;;  %647 = vmatpush.msra.mxu3 %v526_v25  ;;  %v470_v42 = vld [vmem:[%s2722_s1 + $0x18] sm:$0xff]  ;;  %v505_v44 = vld [vmem:[%s2722_s1 + $0x130] sm:$0xff]  ;;  %v504_v48 = vld [vmem:[%s2722_s1 + $0x128] sm:$0xff] }
  0x3b   : > { %590 = vmatpush.msra.mxu0 %v475_v22  ;;  %628 = vmatpush.msra.mxu2 %v509_v28  ;;  %v486_v43 = vld [vmem:[%s2722_s1 + $0x98] sm:$0xff]  ;;  %v521_v45 = vld [vmem:[%s2722_s1 + $0x1b0] sm:$0xff]  ;;  %v520_v49 = vld [vmem:[%s2722_s1 + $0x1a8] sm:$0xff] }
  0x3c   : > { %610 = vmatpush.msra.mxu1 %v491_v23  ;;  %648 = vmatpush.msra.mxu3 %v525_v29  ;;  %v469_v46 = vld [vmem:[%s2722_s1 + $0x10] sm:$0xff]  ;;  %v468_v50 = vld [vmem:[%s2722_s1 + $0x8] sm:$0xff]  ;;  %v503_v52 = vld [vmem:[%s2722_s1 + $0x120] sm:$0xff] }
  0x3d   : > { %591 = vmatpush.msra.mxu0 %v474_v26  ;;  %629 = vmatpush.msra.mxu2 %v508_v32  ;;  %v485_v47 = vld [vmem:[%s2722_s1 + $0x90] sm:$0xff]  ;;  %v484_v51 = vld [vmem:[%s2722_s1 + $0x88] sm:$0xff]  ;;  %v519_v53 = vld [vmem:[%s2722_s1 + $0x1a0] sm:$0xff] }
  0x3e   : > { %611 = vmatpush.msra.mxu1 %v490_v27  ;;  %649 = vmatpush.msra.mxu3 %v524_v33  ;;  %v465_v54 = vld [vmem:[%s2124_s19 + $0x8] sm:$0xff]  ;;  %v467_v55 = vld [vmem:[%s2722_s1] sm:$0xff]  ;;  %v546_v57 = vld [vmem:[%s2722_s1 + $0x278] sm:$0xff] }
  0x3f   : > { %592 = vmatpush.msra.mxu0 %v473_v30  ;;  %630 = vmatpush.msra.mxu2 %v507_v36  ;;  %v483_v56 = vld [vmem:[%s2722_s1 + $0x80] sm:$0xff]  ;;  %568 = vst [vmem:[#allocation1 + $0x10] ss:$2 sm:$0xff] %v465_v54  ;;  %v562_v58 = vld [vmem:[%s2722_s1 + $0x2f8] sm:$0xff]  ;;  %v545_v60 = vld [vmem:[%s2722_s1 + $0x270] sm:$0xff] }
  0x40   : > { %612 = vmatpush.msra.mxu1 %v489_v31  ;;  %650 = vmatpush.msra.mxu3 %v523_v37  ;;  %v464_v59 = vld [vmem:[%s2124_s19] sm:$0xff]  ;;  %v502_v61 = vld [vmem:[%s2722_s1 + $0x118] sm:$0xff]  ;;  %v544_v63 = vld [vmem:[%s2722_s1 + $0x268] sm:$0xff] }
  0x41   : > { %593 = vmatpush.msra.mxu0 %v472_v34  ;;  %631 = vmatpush.msra.mxu2 %v506_v40  ;;  %v518_v62 = vld [vmem:[%s2722_s1 + $0x198] sm:$0xff]  ;;  %566 = vst [vmem:[#allocation1] ss:$2 sm:$0xff] %v464_v59  ;;  %v561_v0 = vld [vmem:[%s2722_s1 + $0x2f0] sm:$0xff]  ;;  %v560_v1 = vld [vmem:[%s2722_s1 + $0x2e8] sm:$0xff] }
  0x42   : > { %613 = vmatpush.msra.mxu1 %v488_v35  ;;  %651 = vmatpush.msra.mxu3 %v522_v41  ;;  %v501_v2 = vld [vmem:[%s2722_s1 + $0x110] sm:$0xff]  ;;  %v500_v5 = vld [vmem:[%s2722_s1 + $0x108] sm:$0xff]  ;;  %v543_v7 = vld [vmem:[%s2722_s1 + $0x260] sm:$0xff] }
  0x43   : > { %594 = vmatpush.msra.mxu0 %v471_v38  ;;  %632 = vmatpush.msra.mxu2 %v505_v44  ;;  %v517_v3 = vld [vmem:[%s2722_s1 + $0x190] sm:$0xff]  ;;  %v516_v6 = vld [vmem:[%s2722_s1 + $0x188] sm:$0xff]  ;;  %v559_v8 = vld [vmem:[%s2722_s1 + $0x2e0] sm:$0xff] }
  0x44   : > { %614 = vmatpush.msra.mxu1 %v487_v39  ;;  %652 = vmatpush.msra.mxu3 %v521_v45  ;;  %v466_v4 = vld [vmem:[%s2124_s19 + $0x10] sm:$0xff]  ;;  %v499_v9 = vld [vmem:[%s2722_s1 + $0x100] sm:$0xff]  ;;  %v542_v11 = vld [vmem:[%s2722_s1 + $0x258] sm:$0xff] }
  0x45   : > { %595 = vmatpush.msra.mxu0 %v470_v42  ;;  %633 = vmatpush.msra.mxu2 %v504_v48  ;;  %570 = vst [vmem:[#allocation1 + $0x20] ss:$2 sm:$0xff] %v466_v4  ;;  %v515_v10 = vld [vmem:[%s2722_s1 + $0x180] sm:$0xff]  ;;  %v558_v12 = vld [vmem:[%s2722_s1 + $0x2d8] sm:$0xff]  ;;  %v541_v15 = vld [vmem:[%s2722_s1 + $0x250] sm:$0xff] }
  0x46   : > { %615 = vmatpush.msra.mxu1 %v486_v43  ;;  %653 = vmatpush.msra.mxu3 %v520_v49  ;;  %v573_v13 = vld.sshfl [vmem:[#allocation1 + $0x10] sm:$0xff pattern:$0x75316420]  ;;  %v574_v14 = vld.sshfl [vmem:[#allocation1 + $0x18] sm:$0xff pattern:$0x75316420] }
  0x47   : > { %596 = vmatpush.msra.mxu0 %v469_v46  ;;  %634 = vmatpush.msra.mxu2 %v503_v52  ;;  %v557_v16 = vld [vmem:[%s2722_s1 + $0x2d0] sm:$0xff]  ;;  %v540_v19 = vld [vmem:[%s2722_s1 + $0x248] sm:$0xff]  ;;  %v539_v21 = vld [vmem:[%s2722_s1 + $0x240] sm:$0xff] }
  0x48   : > { %616 = vmatpush.msra.mxu1 %v485_v47  ;;  %654 = vmatpush.msra.mxu3 %v519_v53  ;;  %v571_v17 = vld.sshfl [vmem:[#allocation1] sm:$0xff pattern:$0x75316420]  ;;  %v572_v18 = vld.sshfl [vmem:[#allocation1 + $0x8] sm:$0xff pattern:$0x75316420] }
  0x49   : > { %597 = vmatpush.msra.mxu0 %v468_v50  ;;  %635 = vmatpush.msra.mxu2 %v502_v61  ;;  %v556_v20 = vld [vmem:[%s2722_s1 + $0x2c8] sm:$0xff]  ;;  %v555_v22 = vld [vmem:[%s2722_s1 + $0x2c0] sm:$0xff]  ;;  %v538_v23 = vld [vmem:[%s2722_s1 + $0x238] sm:$0xff] }
  0x4a   : > { %617 = vmatpush.msra.mxu1 %v484_v51  ;;  %655 = vmatpush.msra.mxu3 %v518_v62  ;;  %v554_v24 = vld [vmem:[%s2722_s1 + $0x2b8] sm:$0xff]  ;;  %v537_v25 = vld [vmem:[%s2722_s1 + $0x230] sm:$0xff]  ;;  %v536_v27 = vld [vmem:[%s2722_s1 + $0x228] sm:$0xff] }
  0x4b   : > { %598 = vmatpush.msra.mxu0 %v467_v55  ;;  %636 = vmatpush.msra.mxu2 %v501_v2  ;;  %v553_v26 = vld [vmem:[%s2722_s1 + $0x2b0] sm:$0xff]  ;;  %v552_v28 = vld [vmem:[%s2722_s1 + $0x2a8] sm:$0xff]  ;;  %v535_v29 = vld [vmem:[%s2722_s1 + $0x220] sm:$0xff] }
  0x4c   : > { %618 = vmatpush.msra.mxu1 %v483_v56  ;;  %656 = vmatpush.msra.mxu3 %v517_v3  ;;  %v551_v30 = vld [vmem:[%s2722_s1 + $0x2a0] sm:$0xff]  ;;  %v534_v31 = vld [vmem:[%s2722_s1 + $0x218] sm:$0xff]  ;;  %v533_v33 = vld [vmem:[%s2722_s1 + $0x210] sm:$0xff] }
  0x4d   : > { %663 = vmatpush.msrb.mxu0 %v546_v57  ;;  %637 = vmatpush.msra.mxu2 %v500_v5  ;;  %v550_v32 = vld [vmem:[%s2722_s1 + $0x298] sm:$0xff]  ;;  %v549_v34 = vld [vmem:[%s2722_s1 + $0x290] sm:$0xff]  ;;  %v532_v35 = vld [vmem:[%s2722_s1 + $0x208] sm:$0xff]  ;;  %v1979_v57 = vmov 64.0  }
  0x4e   : > { %683 = vmatpush.msrb.mxu1 %v562_v58  ;;  %657 = vmatpush.msra.mxu3 %v516_v6  ;;  %v548_v36 = vld [vmem:[%s2722_s1 + $0x288] sm:$0xff]  ;;  %v531_v37 = vld [vmem:[%s2722_s1 + $0x200] sm:$0xff]  ;;  %1831 = vrcp.f32 %v1979_v57 }
  0x4f   : > { %664 = vmatpush.msrb.mxu0 %v545_v60  ;;  %638 = vmatpush.msra.mxu2 %v499_v9  ;;  %v547_v38 = vld [vmem:[%s2722_s1 + $0x280] sm:$0xff]  ;;  %v576_v40 = vld.sshfl [vmem:[#allocation1 + $0x28] sm:$0xff pattern:$0x75316420] }
  0x50   : > { %684 = vmatpush.msrb.mxu1 %v561_v0  ;;  %658 = vmatpush.msra.mxu3 %v515_v10  ;;  %v575_v39 = vld.sshfl [vmem:[#allocation1 + $0x20] sm:$0xff pattern:$0x75316420] }
  0x51   : > { %665 = vmatpush.msrb.mxu0 %v544_v63  ;;  %639 = vmatmul.f32.vlgmr.msra.gmra.mxu2 %v573_v13  ;;  %v703_v41 = vld [vmem:[%s2723_s2] sm:$0x1] }
  0x52   : > { %685 = vmatpush.msrb.mxu1 %v560_v1  ;;  %659 = vmatmul.f32.vlgmr.msra.gmra.mxu3 %v574_v14  ;;  %705 = vst.msk [vmem:[#allocation2] sm:$0x1] %vm704_vm0, %v703_v41  ;;  %v709_v53 = vld [vmem:[%s2724_s3] sm:$0x1f] }
  0x53   : > { %666 = vmatpush.msrb.mxu0 %v543_v7  ;;  %619 = vmatmul.f32.vlgmr.msra.gmra.mxu1 %v572_v18  ;;  %v1829_v14 = vld [vmem:[%s2723_s2 + $0x1] ss:$0 sm:$0xff] }
  0x54   : > { %686 = vmatpush.msrb.mxu1 %v559_v8  ;;  %599 = vmatmul.f32.vlgmr.msra.gmra.mxu0 %v571_v17  ;;  %v1832_v58 = vpop.eup %1831 }
  0x55   : > { %667 = vmatpush.msrb.mxu0 %v542_v11  ;;  %v718_v59 = vmul.f32 64.0, %v1832_v58  ;;  %vm722_vm3 = vweird.f32 %v1832_v58 }
  0x56   : > { %687 = vmatpush.msrb.mxu1 %v558_v12 }
  0x57   : > { %668 = vmatpush.msrb.mxu0 %v541_v15  ;;  %v719_v60 = vsub.f32 1.0, %v718_v59 }
  0x58   : > { %688 = vmatpush.msrb.mxu1 %v557_v16  ;;  %v1830_v16 = vld [vmem:[%s2723_s2 + $0x2] ss:$0 sm:$0xff] }
  0x59   : > { %669 = vmatpush.msrb.mxu0 %v540_v19  ;;  %v720_v61 = vmul.f32 %v1832_v58, %v719_v60 }
  0x5a   : > { %689 = vmatpush.msrb.mxu1 %v556_v20 }
  0x5b   : > { %670 = vmatpush.msrb.mxu0 %v539_v21  ;;  %v721_v62 = vadd.f32 %v1832_v58, %v720_v61 }
  0x5c   : > { %690 = vmatpush.msrb.mxu1 %v555_v22 }
  0x5d   : > { %671 = vmatpush.msrb.mxu0 %v538_v23  ;;  %v723_v63 = vsel %vm722_vm3, %v1832_v58, %v721_v62 }
  0x5e   : > { %691 = vmatpush.msrb.mxu1 %v554_v24 }
  0x5f   : > { %672 = vmatpush.msrb.mxu0 %v537_v25 }
  0x60   : > { %692 = vmatpush.msrb.mxu1 %v553_v26 }
  0x61   : > { %673 = vmatpush.msrb.mxu0 %v536_v27 }
  0x62   : > { %693 = vmatpush.msrb.mxu1 %v552_v28 }
  0x63   : > { %674 = vmatpush.msrb.mxu0 %v535_v29 }
  0x64   : > { %694 = vmatpush.msrb.mxu1 %v551_v30 }
  0x65   : > { %675 = vmatpush.msrb.mxu0 %v534_v31 }
  0x66   : > { %695 = vmatpush.msrb.mxu1 %v550_v32 }
  0x67   : > { %676 = vmatpush.msrb.mxu0 %v533_v33 }
  0x68   : > { %696 = vmatpush.msrb.mxu1 %v549_v34 }
  0x69   : > { %677 = vmatpush.msrb.mxu0 %v532_v35 }
  0x6a   : > { %697 = vmatpush.msrb.mxu1 %v548_v36 }
  0x6b   : > { %678 = vmatpush.msrb.mxu0 %v531_v37 }
  0x6c   : > { %698 = vmatpush.msrb.mxu1 %v547_v38  ;;  %679 = vmatmul.f32.vlgmr.msrb.gmra.mxu0 %v575_v39 }
  0x6d   : > { %699 = vmatmul.f32.vlgmr.msrb.gmra.mxu1 %v576_v40 }
  0xd0   : > { %v620_v43 = vpop.f32.mrf.mxu1 }
  0xd1   : > { %v600_v42 = vpop.f32.mrf.mxu0 }
  0xd2   : > { %v621_v44 = vadd.f32 %v620_v43, %v600_v42 }
  0xd4   : > { %v640_v45 = vpop.f32.mrf.mxu2 }
  0xd5   : > { %v641_v46 = vadd.f32 %v640_v45, %v621_v44  ;;  %v660_v47 = vpop.f32.mrf.mxu3 }
  0xd7   : > { %v661_v48 = vadd.f32 %v660_v47, %v641_v46 }
  0xe9   : > { %v680_v49 = vpop.f32.mrf.mxu0 }
  0xea   : > { %v700_v50 = vpop.f32.mrf.mxu1  ;;  %v681_v51 = vadd.f32 %v680_v49, %v661_v48 }
  0xec   : > { %v701_v52 = vadd.f32 %v700_v50, %v681_v51 }
  0xee   : > { %707 = vst.msk [vmem:[#allocation2 + $0x1] sm:$0xf] %vm706_vm1, %v701_v52 }
  0xf5   : > { %v708_v54 = vld [vmem:[#allocation2] sm:$0x1f] }
  0xf6   : > { %v710_v55 = vadd.f32 %v709_v53, %v708_v54 }
  0xf8   : > { %v714_v56 = vsel %vm713_vm2, %v710_v55, 0.0 }
  0xf9   : > { %715 = vadd.xlane.f32.xlu0 %v714_v56 }
 0x16c   : > { %v716_v0 = vpop.xlane.xlu0 %715 }
 0x16d   : > { %v724_v1 = vmul.f32 %v723_v63, %v716_v0 }
 0x16f   : > { %v725_v2 = vsub.f32 %v710_v55, %v724_v1 }
 0x171   : > { %v726_v3 = vmul.f32 %v725_v2, %v725_v2 }
 0x173   : > { %v727_v4 = vsel %vm713_vm2, %v726_v3, 0.0 }
 0x174   : > { %728 = vadd.xlane.f32.xlu0 %v727_v4 }
 0x1e7   : > { %v729_v5 = vpop.xlane.xlu0 %728 }
 0x1e8   : > { %v730_v6 = vmul.f32 %v729_v5, %v723_v63 }
 0x1ea   : > { %v731_v7 = vadd.f32 1e-05, %v730_v6 }
 0x1ec   : > { %1833 = vrsqrt.f32 %v731_v7  ;;  %vm738_vm5 = vweird.f32 %v731_v7 }
 0x1f2   : > { %v1834_v8 = vpop.eup %1833 }
 0x1f3   : > { %v733_v9 = vmul.f32 %v1834_v8, %v731_v7  ;;  %vm739_vm4 = vweird.f32 %v1834_v8 }
 0x1f4   : > { %vm740_vm6 = vmor %vm738_vm5, %vm739_vm4 }
 0x1f5   : > { %v734_v10 = vmul.f32 %v1834_v8, %v733_v9 }
 0x1f7   : > { %v735_v11 = vmul.f32 0.5, %v734_v10 }
 0x1f9   : > { %v736_v12 = vsub.f32 1.5, %v735_v11 }
 0x1fb   : > { %v737_v13 = vmul.f32 %v1834_v8, %v736_v12 }
 0x1fd   : > { %v741_v15 = vsel %vm740_vm6, %v1834_v8, %v737_v13 }
 0x1fe   : > { %v742_v17 = vmul.f32 %v741_v15, %v725_v2 }
 0x200   : > { %v744_v18 = vmul.f32 %v1829_v14, %v742_v17 }
 0x202   : > { %v746_v19 = vadd.f32 %v1830_v16, %v744_v18 }
 0x204   : > { %747 = vst.msk [vmem:[#allocation2] sm:$0x1f] %vm713_vm2, %v746_v19 }
 0x205 PF: > { %vm830_vm7 = vcmask 520192   ;;  %v1980_v22 = vmov 64.0   ;;  %v763_v34 = vld [vmem:[%s2129_s15 + $0x70] sm:$0xff]  ;;  %v764_v35 = vld [vmem:[%s2129_s15 + $0x78] sm:$0xff]  ;;  %v761_v36 = vld [vmem:[%s2129_s15 + $0x60] sm:$0xff]  ;;  %vm869_vm12 = vcmask 523264  }
 0x206   : > { %1841 = vrcp.f32 %v1980_v22  ;;  %881 = vmatpush.msra.mxu0 %v763_v34  ;;  %901 = vmatpush.msra.mxu1 %v764_v35  ;;  %v762_v37 = vld [vmem:[%s2129_s15 + $0x68] sm:$0xff]  ;;  %v759_v38 = vld [vmem:[%s2129_s15 + $0x50] sm:$0xff]  ;;  %v760_v39 = vld [vmem:[%s2129_s15 + $0x58] sm:$0xff]  ;;  %vm957_vm13 = vcmask 1044480   ;;  %s1981_s30 = smov 112   ;;  %s1982_s10 = smov 48  }
 0x207   : > { %v757_v40 = vld [vmem:[%s2129_s15 + $0x40] sm:$0xff]  ;;  %v758_v41 = vld [vmem:[%s2129_s15 + $0x48] sm:$0xff]  ;;  %v755_v42 = vld [vmem:[%s2129_s15 + $0x30] sm:$0xff]  ;;  %s1983_s20 = smov 64   ;;  %s1984_s25 = smov 96   ;;  %vm916_vm14 = vcmask 130048  }
 0x208   : > { %882 = vmatpush.msra.mxu0 %v761_v36  ;;  %902 = vmatpush.msra.mxu1 %v762_v37  ;;  %v756_v43 = vld [vmem:[%s2129_s15 + $0x38] sm:$0xff]  ;;  %v753_v44 = vld [vmem:[%s2129_s15 + $0x20] sm:$0xff]  ;;  %v754_v45 = vld [vmem:[%s2129_s15 + $0x28] sm:$0xff]  ;;  %s1985_s17 = smov 32   ;;  %s1986_s21 = smov 80   ;;  %vm941_vm15 = vcmask 36864  }
 0x209   : > { %v751_v46 = vld [vmem:[%s2129_s15 + $0x10] sm:$0xff]  ;;  %v752_v47 = vld [vmem:[%s2129_s15 + $0x18] sm:$0xff]  ;;  %v749_v48 = vld [vmem:[%s2129_s15] sm:$0xff]  ;;  %s1987_s12 = smov 16   ;;  %vm953_vm0 = vcmask 39936   ;;  %vm1192_vm1 = vcmask 261120  }
 0x20a   : > { %883 = vmatpush.msra.mxu0 %v759_v38  ;;  %903 = vmatpush.msra.mxu1 %v760_v39  ;;  %v750_v49 = vld [vmem:[%s2129_s15 + $0x8] sm:$0xff]  ;;  %v1835_v59 = vld [vmem:[%s2144_s22] ss:$0 sm:$0xff]  ;;  %v1836_v62 = vld [vmem:[%s2144_s22 + $0x1] ss:$0 sm:$0xff]  ;;  %vm1194_vm2 = vcmask 392192  }
 0x20b   : > { %v2459_v20 = vld [vmem:[#allocation2] sm:$0x1f]  ;;  %v821_v1 = vld [vmem:[%s2139_s14] ss:$2 sm:$0x3]  ;;  %p1733_p1 = scmp.ne.s32.totalorder %s1961_s16, 6 }
 0x20c   : > { %v831_v21 = vsel %vm830_vm7, %v2459_v20, 0.0  ;;  %v1842_v23 = vpop.eup %1841  ;;  %884 = vmatpush.msra.mxu0 %v757_v40  ;;  %904 = vmatpush.msra.mxu1 %v758_v41  ;;  %v865_v2 = vperm.slane %v821_v1, 0  ;;  %v866_v3 = vperm.slane %v821_v1, 1  ;;  %v819_v1 = vld [vmem:[%s2134_s13 + $0x130] sm:$0xff] }
 0x20d   : > { %832 = vadd.xlane.f32.xlu0 %v831_v21  ;;  %v835_v24 = vmul.f32 64.0, %v1842_v23  ;;  %vm839_vm8 = vweird.f32 %v1842_v23 }
 0x20e   : > { %885 = vmatpush.msra.mxu0 %v755_v42  ;;  %905 = vmatpush.msra.mxu1 %v756_v43 }
 0x20f   : > { %v836_v25 = vsub.f32 1.0, %v835_v24 }
 0x210   : > { %886 = vmatpush.msra.mxu0 %v753_v44  ;;  %906 = vmatpush.msra.mxu1 %v754_v45 }
 0x211   : > { %v837_v26 = vmul.f32 %v1842_v23, %v836_v25 }
 0x212   : > { %887 = vmatpush.msra.mxu0 %v751_v46  ;;  %907 = vmatpush.msra.mxu1 %v752_v47 }
 0x213   : > { %v838_v27 = vadd.f32 %v1842_v23, %v837_v26 }
 0x214   : > { %888 = vmatpush.msra.mxu0 %v749_v48  ;;  %908 = vmatpush.msra.mxu1 %v750_v49 }
 0x215   : > { %v2463_v28 = vsel %vm839_vm8, %v1842_v23, %v838_v27 }
 0x280   : > { %v833_v29 = vpop.xlane.xlu0 %832 }
 0x281   : > { %v841_v30 = vmul.f32 %v2463_v28, %v833_v29 }
 0x283   : > { %v842_v31 = vsub.f32 %v2459_v20, %v841_v30 }
 0x285   : > { %v843_v32 = vmul.f32 %v842_v31, %v842_v31 }
 0x287   : > { %v844_v33 = vsel %vm830_vm7, %v843_v32, 0.0 }
 0x288   : > { %845 = vadd.xlane.f32.xlu0 %v844_v33 }
 0x2fb   : > { %v846_v50 = vpop.xlane.xlu0 %845 }
 0x2fc   : > { %v847_v51 = vmul.f32 %v846_v50, %v2463_v28 }
 0x2fe   : > { %v848_v52 = vadd.f32 1e-05, %v847_v51 }
 0x300   : > { %1843 = vrsqrt.f32 %v848_v52  ;;  %vm855_vm10 = vweird.f32 %v848_v52 }
 0x306   : > { %v1844_v53 = vpop.eup %1843 }
 0x307   : > { %v850_v54 = vmul.f32 %v1844_v53, %v848_v52  ;;  %vm856_vm9 = vweird.f32 %v1844_v53 }
 0x308   : > { %vm857_vm11 = vmor %vm855_vm10, %vm856_vm9 }
 0x309   : > { %v851_v55 = vmul.f32 %v1844_v53, %v850_v54 }
 0x30b   : > { %v852_v56 = vmul.f32 0.5, %v851_v55 }
 0x30d   : > { %v853_v57 = vsub.f32 1.5, %v852_v56 }
 0x30f   : > { %v854_v58 = vmul.f32 %v1844_v53, %v853_v57 }
 0x311   : > { %v858_v60 = vsel %vm857_vm11, %v1844_v53, %v854_v58 }
 0x312   : > { %v859_v61 = vmul.f32 %v858_v60, %v842_v31 }
 0x314   : > { %v861_v63 = vmul.f32 %v1835_v59, %v859_v61 }
 0x316   : > { %v863_v0 = vadd.f32 %v1836_v62, %v861_v63 }
 0x318   : > { %1710 = vmatmul.msk.f32.vlgmr.msra.gmra.mxu0 %vm869_vm12, %v863_v0  ;;  %1711 = vmatmul.msk.f32.vlgmr.msra.gmra.mxu1 %vm869_vm12, %v863_v0  ;;  %v820_v0 = vld [vmem:[%s2134_s13 + $0x138] sm:$0xff] }
 0x395   : > { %v890_v4 = vpop.f32.mrf.mxu0  ;;  %v910_v5 = vpop.f32.mrf.mxu1 }
 0x396   : > { %v891_v6 = vadd.f32 %v890_v4, %v865_v2  ;;  %v2490_v7 = vadd.f32 %v910_v5, %v866_v3  ;;  %v818_v2 = vld [vmem:[%s2134_s13 + $0x128] sm:$0xff]  ;;  %v817_v3 = vld [vmem:[%s2134_s13 + $0x120] sm:$0xff]  ;;  %v816_v4 = vld [vmem:[%s2134_s13 + $0x118] sm:$0xff] }
 0x397   : > { %v815_v5 = vld [vmem:[%s2134_s13 + $0x110] sm:$0xff] }
 0x398   : > { %1714 = vmatpush.msk.msra.mxu3 %vm957_vm13, %v2490_v7  ;;  %981 = vrot.lane.b32.xlu0 %v891_v6, %s1981_s30 }
 0x399   : > { %983 = vrot.lane.b32.xlu2 %v891_v6, %s1982_s10  ;;  %914 = vrot.lane.b32.xlu1 %v891_v6, %s1983_s20 }
 0x3a0   : > { %1047 = vrot.lane.b32.xlu0 %v891_v6, %s1984_s25 }
 0x3a1   : > { %1049 = vrot.lane.b32.xlu2 %v891_v6, %s1985_s17 }
 0x3a8   : > { %1113 = vrot.lane.b32.xlu0 %v891_v6, %s1986_s21 }
 0x3f3   : > { %v984_v8 = vpop.permute.xlu2 %983 }
 0x3f4   : > { %1716 = vmatpush.xpose.msk.msrb.mxu3 %vm916_vm14, %v984_v8 }
 0x3fb   : > { %v1050_v18 = vpop.permute.xlu2 %1049 }
 0x40a   : > { %v982_v17 = vpop.permute.xlu0 %981 }
 0x40b   : > { %v915_v9 = vpop.permute.xlu1 %914 }
 0x40c   : > { %1712 = vmatpush.xpose.msk.msra.mxu2 %vm916_vm14, %v915_v9 }
 0x40f   : > { %1713 = vmatmul.msk.f32.vlgmr.msra.gmra.mxu2 %vm916_vm14, %v891_v6 }
 0x412   : > { %v1048_v21 = vpop.permute.xlu0 %1047 }
 0x41a   : > { %v1114_v25 = vpop.permute.xlu0 %1113 }
 0x492   : > { %v938_v10 = vpop.f32.mrf.mxu2 }
 0x493   : > { %v942_v11 = vsel %vm941_vm15, %v938_v10, -inf }
 0x494   : > { %943 = vmax.xlane.f32.xlu1 %v942_v11 }
 0x507   : > { %v944_v12 = vpop.xlane.xlu1 %943 }
 0x508   : > { %v945_v13 = vsub.f32 %v938_v10, %v944_v12 }
 0x50a   : > { %v946_v14 = vmul.f32 1.442695, %v945_v13 }
 0x50c   : > { %1845 = vpow2.f32 %v946_v14  ;;  %v1837_v14 = vld [vmem:[%s2144_s22 + $0x2] ss:$0 sm:$0xff] }
 0x512   : > { %v1846_v15 = vpop.eup %1845 }
 0x513   : > { %v948_v16 = vsel %vm941_vm15, %v1846_v15, 0.0 }
 0x514   : > { %949 = vadd.xlane.f32.xlu2 %v948_v16 }
 0x52c   : > { %1115 = vrot.lane.b32.xlu2 %v891_v6, %s1987_s12  ;;  %v814_v6 = vld [vmem:[%s2134_s13 + $0x108] sm:$0xff] }
 0x587   : > { %v950_v19 = vpop.xlane.xlu2 %949 }
 0x588   : > { %1847 = vrcp.f32 %v950_v19 }
 0x58e   : > { %v1848_v22 = vpop.eup %1847 }
 0x58f   : > { %v1116_v23 = vpop.permute.xlu2 %1115  ;;  %v952_v24 = vmul.f32 %v1848_v22, %v1846_v15 }
 0x590   : > { %1724 = vmatpush.xpose.msk.msrb.mxu0 %vm916_vm14, %v1116_v23 }
 0x591   : > { %1715 = vmatmul.msk.f32.vlgmr.msra.gmra.mxu3 %vm953_vm0, %v952_v24 }
 0x592   : > { %1720 = vmatpush.xpose.msk.msra.mxu3 %vm916_vm14, %v1050_v18 }
 0x593   : > { %1725 = vmatmul.msk.f32.vlgmr.msrb.gmra.mxu0 %vm916_vm14, %v1114_v25  ;;  %v779_v25 = vld [vmem:[%s2129_s15 + $0xf0] sm:$0xff] }
 0x599   : > { %1717 = vmatmul.msk.f32.vlgmr.msrb.gmra.mxu3 %vm916_vm14, %v982_v17 }
 0x5a1   : > { %1721 = vmatmul.msk.f32.vlgmr.msra.gmra.mxu3 %vm916_vm14, %v1048_v21 }
 0x610   : > { %v1138_v26 = vpop.f32.mrf.mxu0 }
 0x611   : > { %v1141_v27 = vsel %vm941_vm15, %v1138_v26, -inf }
 0x612   : > { %1142 = vmax.xlane.f32.xlu0 %v1141_v27  ;;  %v778_v27 = vld [vmem:[%s2129_s15 + $0xe8] sm:$0xff] }
 0x614   : > { %v2512_v29 = vpop.f32.mrf.mxu3 }
 0x61c   : > { %v1006_v30 = vpop.f32.mrf.mxu3 }
 0x61d   : > { %v1009_v31 = vsel %vm941_vm15, %v1006_v30, -inf }
 0x61e   : > { %1010 = vmax.xlane.f32.xlu2 %v1009_v31  ;;  %v773_v31 = vld [vmem:[%s2129_s15 + $0xc0] sm:$0xff] }
 0x624   : > { %v1072_v32 = vpop.f32.mrf.mxu3 }
 0x625   : > { %v1075_v33 = vsel %vm941_vm15, %v1072_v32, -inf }
 0x626   : > { %1076 = vmax.xlane.f32.xlu1 %v1075_v33  ;;  %1086 = vrot.lane.b32.xlu0 %v2490_v7, %s1984_s25  ;;  %v771_v33 = vld [vmem:[%s2129_s15 + $0xb0] sm:$0xff] }
 0x685   : > { %v1143_v34 = vpop.xlane.xlu0 %1142 }
 0x686   : > { %v1144_v35 = vsub.f32 %v1138_v26, %v1143_v34  ;;  %v777_v26 = vld [vmem:[%s2129_s15 + $0xe0] sm:$0xff]  ;;  %v772_v34 = vld [vmem:[%s2129_s15 + $0xb8] sm:$0xff] }
 0x688   : > { %v1145_v36 = vmul.f32 1.442695, %v1144_v35  ;;  %v769_v35 = vld [vmem:[%s2129_s15 + $0xa0] sm:$0xff] }
 0x68a   : > { %1849 = vpow2.f32 %v1145_v36  ;;  %v770_v36 = vld [vmem:[%s2129_s15 + $0xa8] sm:$0xff] }
 0x690   : > { %v1850_v37 = vpop.eup %1849 }
 0x691   : > { %v1011_v38 = vpop.xlane.xlu2 %1010  ;;  %v1147_v39 = vsel %vm941_vm15, %v1850_v37, 0.0 }
 0x692   : > { %v1012_v40 = vsub.f32 %v1006_v30, %v1011_v38  ;;  %1148 = vadd.xlane.f32.xlu2 %v1147_v39  ;;  %v776_v30 = vld [vmem:[%s2129_s15 + $0xd8] sm:$0xff]  ;;  %v765_v39 = vld [vmem:[%s2129_s15 + $0x80] sm:$0xff] }
 0x693   : > { %v768_v38 = vld [vmem:[%s2129_s15 + $0x98] sm:$0xff] }
 0x694   : > { %v1013_v41 = vmul.f32 1.442695, %v1012_v40  ;;  %v766_v40 = vld [vmem:[%s2129_s15 + $0x88] sm:$0xff] }
 0x696   : > { %1851 = vpow2.f32 %v1013_v41 }
 0x698   : > { %v1087_v58 = vpop.permute.xlu0 %1086 }
 0x699   : > { %v1077_v42 = vpop.xlane.xlu1 %1076 }
 0x69a   : > { %v1078_v43 = vsub.f32 %v1072_v32, %v1077_v42  ;;  %v774_v32 = vld [vmem:[%s2129_s15 + $0xc8] sm:$0xff] }
 0x69c   : > { %v1852_v44 = vpop.eup %1851  ;;  %v1079_v45 = vmul.f32 1.442695, %v1078_v43 }
 0x69d   : > { %v1015_v46 = vsel %vm941_vm15, %v1852_v44, 0.0 }
 0x69e   : > { %1853 = vpow2.f32 %v1079_v45  ;;  %1016 = vadd.xlane.f32.xlu1 %v1015_v46 }
 0x6a4   : > { %v1854_v47 = vpop.eup %1853 }
 0x6a5   : > { %v1081_v48 = vsel %vm941_vm15, %v1854_v47, 0.0 }
 0x6a6   : > { %1082 = vadd.xlane.f32.xlu1 %v1081_v48 }
 0x6aa   : > { %1152 = vrot.lane.b32.xlu2 %v2490_v7, %s1986_s21 }
 0x6bf   : > { %1020 = vrot.lane.b32.xlu1 %v2490_v7, %s1981_s30  ;;  %v813_v7 = vld [vmem:[%s2134_s13 + $0x100] sm:$0xff] }
 0x705   : > { %v1149_v49 = vpop.xlane.xlu2 %1148 }
 0x706   : > { %1855 = vrcp.f32 %v1149_v49 }
 0x70c   : > { %v1856_v50 = vpop.eup %1855 }
 0x70d   : > { %v1151_v51 = vmul.f32 %v1856_v50, %v1850_v37  ;;  %v1153_v52 = vpop.permute.xlu2 %1152  ;;  %v767_v37 = vld [vmem:[%s2129_s15 + $0x90] sm:$0xff]  ;;  %v1838_v50 = vld [vmem:[%s2144_s22 + $0x3] ss:$0 sm:$0xff] }
 0x70e   : > { %1726 = vmatpush.msk.msra.mxu0 %vm957_vm13, %v1153_v52 }
 0x70f   : > { %1727 = vmatmul.msk.f32.vlgmr.msra.gmra.mxu0 %vm953_vm0, %v1151_v51 }
 0x711   : > { %v1017_v53 = vpop.xlane.xlu1 %1016 }
 0x712   : > { %1857 = vrcp.f32 %v1017_v53  ;;  %v1839_v53 = vld [vmem:[%s2144_s22 + $0x4] ss:$0 sm:$0xff] }
 0x718   : > { %v1858_v55 = vpop.eup %1857 }
 0x719   : > { %v1083_v54 = vpop.xlane.xlu1 %1082  ;;  %v1019_v57 = vmul.f32 %v1858_v55, %v1852_v44 }
 0x71a   : > { %1859 = vrcp.f32 %v1083_v54 }
 0x720   : > { %v1860_v59 = vpop.eup %1859 }
 0x721   : > { %v1085_v60 = vmul.f32 %v1860_v59, %v1854_v47  ;;  %v796_v59 = vld [vmem:[%s2134_s13 + $0x78] sm:$0xff] }
 0x722   : > { %1338 = vmatpush.msrb.mxu1 %v796_v59 }
 0x731   : > { %v1021_v56 = vpop.permute.xlu1 %1020 }
 0x732   : > { %1718 = vmatpush.msk.msrb.mxu2 %vm957_vm13, %v1021_v56  ;;  %v812_v56 = vld [vmem:[%s2134_s13 + $0xf8] sm:$0xff] }
 0x733   : > { %1719 = vmatmul.msk.f32.vlgmr.msrb.gmra.mxu2 %vm953_vm0, %v1019_v57  ;;  %1358 = vmatpush.msrb.mxu3 %v812_v56  ;;  %v811_v57 = vld [vmem:[%s2134_s13 + $0xf0] sm:$0xff] }
 0x734   : > { %1722 = vmatpush.msk.msra.mxu2 %vm957_vm13, %v1087_v58  ;;  %v810_v58 = vld [vmem:[%s2134_s13 + $0xe8] sm:$0xff] }
 0x735   : > { %1359 = vmatpush.msrb.mxu3 %v811_v57 }
 0x736   : > { %1208 = vmatpush.msrb.mxu2 %v820_v0  ;;  %v807_v0 = vld [vmem:[%s2134_s13 + $0xd0] sm:$0xff] }
 0x737   : > { %1360 = vmatpush.msrb.mxu3 %v810_v58 }
 0x738   : > { %1209 = vmatpush.msrb.mxu2 %v819_v1  ;;  %v793_v1 = vld [vmem:[%s2134_s13 + $0x60] sm:$0xff] }
 0x73a   : > { %1210 = vmatpush.msrb.mxu2 %v818_v2  ;;  %v806_v2 = vld [vmem:[%s2134_s13 + $0xc8] sm:$0xff] }
 0x73b   : > { %1723 = vmatmul.msk.f32.vlgmr.msra.gmra.mxu2 %vm953_vm0, %v1085_v60  ;;  %v809_v60 = vld [vmem:[%s2134_s13 + $0xe0] sm:$0xff] }
 0x73c   : > { %1211 = vmatpush.msrb.mxu2 %v817_v3  ;;  %1361 = vmatpush.msrb.mxu3 %v809_v60  ;;  %v792_v3 = vld [vmem:[%s2134_s13 + $0x58] sm:$0xff] }
 0x73e   : > { %1212 = vmatpush.msrb.mxu2 %v816_v4  ;;  %v805_v4 = vld [vmem:[%s2134_s13 + $0xc0] sm:$0xff] }
 0x740   : > { %1213 = vmatpush.msrb.mxu2 %v815_v5  ;;  %v791_v5 = vld [vmem:[%s2134_s13 + $0x50] sm:$0xff] }
 0x742   : > { %1214 = vmatpush.msrb.mxu2 %v814_v6  ;;  %v804_v6 = vld [vmem:[%s2134_s13 + $0xb8] sm:$0xff] }
 0x744   : > { %1215 = vmatpush.msrb.mxu2 %v813_v7  ;;  %v790_v7 = vld [vmem:[%s2134_s13 + $0x48] sm:$0xff] }
 0x746   : > { %1263 = vmatpush.msra.mxu2 %v779_v25  ;;  %v784_v25 = vld [vmem:[%s2134_s13 + $0x18] sm:$0xff] }
 0x748   : > { %1264 = vmatpush.msra.mxu2 %v777_v26 }
 0x78c   : > { %v1176_v61 = vpop.f32.mrf.mxu0 }
 0x78d   : > { %1188 = vrot.lane.b32.xlu0 %v1176_v61, %s1982_s10  ;;  %v795_v61 = vld [vmem:[%s2134_s13 + $0x70] sm:$0xff] }
 0x78e   : > { %1339 = vmatpush.msrb.mxu1 %v795_v61 }
 0x7b6   : > { %v1044_v62 = vpop.f32.mrf.mxu2 }
 0x7b7   : > { %1180 = vrot.lane.b32.xlu1 %v1044_v62, %s1987_s12  ;;  %v808_v62 = vld [vmem:[%s2134_s13 + $0xd8] sm:$0xff] }
 0x7b8   : > { %1362 = vmatpush.msrb.mxu3 %v808_v62 }
 0x7ba   : > { %1363 = vmatpush.msrb.mxu3 %v807_v0 }
 0x7bc   : > { %1364 = vmatpush.msrb.mxu3 %v806_v2 }
 0x7be   : > { %v1110_v63 = vpop.f32.mrf.mxu2  ;;  %1365 = vmatpush.msrb.mxu3 %v805_v4 }
 0x7bf   : > { %1184 = vrot.lane.b32.xlu1 %v1110_v63, %s1985_s17  ;;  %v794_v63 = vld [vmem:[%s2134_s13 + $0x68] sm:$0xff] }
 0x7c0   : > { %1340 = vmatpush.msrb.mxu1 %v794_v63  ;;  %1366 = vmatpush.msrb.mxu3 %v804_v6  ;;  %v1840_v63 = vld [vmem:[%s2144_s22 + $0x5] ss:$0 sm:$0xff] }
 0x7c2   : > { %1341 = vmatpush.msrb.mxu1 %v793_v1 }
 0x7c4   : > { %1342 = vmatpush.msrb.mxu1 %v792_v3 }
 0x7c6   : > { %1343 = vmatpush.msrb.mxu1 %v791_v5 }
 0x7c8   : > { %1344 = vmatpush.msrb.mxu1 %v790_v7 }
 0x7ff   : > { %v1189_v11 = vpop.permute.xlu0 %1188 }
 0x829   : > { %v1181_v8 = vpop.permute.xlu1 %1180 }
 0x82a   : > { %v1191_v9 = vsel %vm916_vm14, %v2512_v29, %v1181_v8  ;;  %v775_v29 = vld [vmem:[%s2129_s15 + $0xd0] sm:$0xff] }
 0x82b   : > { %1265 = vmatpush.msra.mxu2 %v775_v29  ;;  %v803_v8 = vld [vmem:[%s2134_s13 + $0xb0] sm:$0xff] }
 0x82c   : > { %1367 = vmatpush.msrb.mxu3 %v803_v8  ;;  %v783_v29 = vld [vmem:[%s2134_s13 + $0x10] sm:$0xff] }
 0x82d   : > { %1266 = vmatpush.msra.mxu2 %v773_v31 }
 0x82f   : > { %1267 = vmatpush.msra.mxu2 %v771_v33 }
 0x831   : > { %v1185_v10 = vpop.permute.xlu1 %1184  ;;  %1268 = vmatpush.msra.mxu2 %v769_v35 }
 0x832   : > { %v1193_v12 = vsel %vm1192_vm1, %v1191_v9, %v1185_v10  ;;  %v789_v9 = vld [vmem:[%s2134_s13 + $0x40] sm:$0xff]  ;;  %v802_v10 = vld [vmem:[%s2134_s13 + $0xa8] sm:$0xff] }
 0x833   : > { %v1195_v13 = vsel %vm1194_vm2, %v1193_v12, %v1189_v11  ;;  %1269 = vmatpush.msra.mxu2 %v767_v37  ;;  %1345 = vmatpush.msrb.mxu1 %v789_v9  ;;  %v1709_v11 = vld [vmem:[%s2139_s14 + $0x1] ss:$2 sm:$0x3]  ;;  %v788_v12 = vld [vmem:[%s2134_s13 + $0x38] sm:$0xff] }
 0x834   : > { %1728 = vmatmul.msk.f32.vlgmr.msrb.gmra.mxu2 %vm869_vm12, %v1195_v13  ;;  %1368 = vmatpush.msrb.mxu3 %v802_v10  ;;  %v801_v13 = vld [vmem:[%s2134_s13 + $0xa0] sm:$0xff] }
 0x835   : > { %1270 = vmatpush.msra.mxu2 %v765_v39  ;;  %1346 = vmatpush.msrb.mxu1 %v788_v12 }
 0x836   : > { %1369 = vmatpush.msrb.mxu3 %v801_v13 }
 0x8b7   : > { %v1217_v15 = vpop.f32.mrf.mxu2 }
 0x8b8   : > { %v1218_v16 = vadd.f32 %v1837_v14, %v1217_v15  ;;  %v787_v14 = vld [vmem:[%s2134_s13 + $0x30] sm:$0xff]  ;;  %v800_v15 = vld [vmem:[%s2134_s13 + $0x98] sm:$0xff] }
 0x8b9   : > { %1347 = vmatpush.msrb.mxu1 %v787_v14  ;;  %1370 = vmatpush.msrb.mxu3 %v800_v15 }
 0x8ba   : > { %v2547_v17 = vadd.f32 %v1218_v16, %v2459_v20  ;;  %v780_v20 = vld [vmem:[%s2129_s15 + $0xf8] sm:$0xff]  ;;  %v1249_v16 = vperm.slane %v1709_v11, 1 }
 0x8bb   : > { %1283 = vmatpush.msrb.mxu0 %v780_v20  ;;  %v797_v20 = vld [vmem:[%s2134_s13 + $0x80] sm:$0xff] }
 0x8bc   : > { %v1221_v18 = vsel %vm830_vm7, %v2547_v17, 0.0 }
 0x8bd   : > { %1222 = vadd.xlane.f32.xlu1 %v1221_v18  ;;  %1284 = vmatpush.msrb.mxu0 %v778_v27  ;;  %v786_v18 = vld [vmem:[%s2134_s13 + $0x28] sm:$0xff]  ;;  %v1248_v27 = vperm.slane %v1709_v11, 0 }
 0x8be   : > { %1348 = vmatpush.msrb.mxu1 %v786_v18 }
 0x8bf   : > { %1285 = vmatpush.msrb.mxu0 %v776_v30 }
 0x8c1   : > { %1286 = vmatpush.msrb.mxu0 %v774_v32  ;;  %v782_v32 = vld [vmem:[%s2134_s13 + $0x8] sm:$0xff] }
 0x8c3   : > { %1287 = vmatpush.msrb.mxu0 %v772_v34  ;;  %v781_v34 = vld [vmem:[%s2134_s13] sm:$0xff] }
 0x8c5   : > { %1288 = vmatpush.msrb.mxu0 %v770_v36 }
 0x8c7   : > { %1289 = vmatpush.msrb.mxu0 %v768_v38 }
 0x8c9   : > { %1290 = vmatpush.msrb.mxu0 %v766_v40 }
 0x930   : > { %v1223_v19 = vpop.xlane.xlu1 %1222 }
 0x931   : > { %v1224_v21 = vmul.f32 %v1223_v19, %v2463_v28  ;;  %v799_v19 = vld [vmem:[%s2134_s13 + $0x90] sm:$0xff] }
 0x932   : > { %1371 = vmatpush.msrb.mxu3 %v799_v19 }
 0x933   : > { %v1225_v22 = vsub.f32 %v2547_v17, %v1224_v21 }
 0x935   : > { %v1226_v23 = vmul.f32 %v1225_v22, %v1225_v22 }
 0x937   : > { %v1227_v24 = vsel %vm830_vm7, %v1226_v23, 0.0  ;;  %v798_v23 = vld [vmem:[%s2134_s13 + $0x88] sm:$0xff] }
 0x938   : > { %1228 = vadd.xlane.f32.xlu2 %v1227_v24  ;;  %1372 = vmatpush.msrb.mxu3 %v798_v23 }
 0x93a   : > { %1373 = vmatpush.msrb.mxu3 %v797_v20 }
 0x9ab   : > { %v1229_v41 = vpop.xlane.xlu2 %1228 }
 0x9ac   : > { %v1230_v42 = vmul.f32 %v1229_v41, %v2463_v28 }
 0x9ae   : > { %v1231_v43 = vadd.f32 1e-05, %v1230_v42 }
 0x9b0   : > { %1861 = vrsqrt.f32 %v1231_v43  ;;  %vm1238_vm4 = vweird.f32 %v1231_v43 }
 0x9b6   : > { %v1862_v44 = vpop.eup %1861 }
 0x9b7   : > { %v1233_v45 = vmul.f32 %v1862_v44, %v1231_v43  ;;  %vm1239_vm3 = vweird.f32 %v1862_v44 }
 0x9b8   : > { %vm1240_vm5 = vmor %vm1238_vm4, %vm1239_vm3 }
 0x9b9   : > { %v1234_v46 = vmul.f32 %v1862_v44, %v1233_v45 }
 0x9bb   : > { %v1235_v47 = vmul.f32 0.5, %v1234_v46 }
 0x9bd   : > { %v1236_v48 = vsub.f32 1.5, %v1235_v47 }
 0x9bf   : > { %v1237_v49 = vmul.f32 %v1862_v44, %v1236_v48 }
 0x9c1   : > { %v1241_v51 = vsel %vm1240_vm5, %v1862_v44, %v1237_v49 }
 0x9c2   : > { %v1242_v52 = vmul.f32 %v1241_v51, %v1225_v22  ;;  %v785_v22 = vld [vmem:[%s2134_s13 + $0x20] sm:$0xff] }
 0x9c3   : > { %1349 = vmatpush.msrb.mxu1 %v785_v22 }
 0x9c4   : > { %v1244_v54 = vmul.f32 %v1838_v50, %v1242_v52 }
 0x9c5   : > { %1350 = vmatpush.msrb.mxu1 %v784_v25 }
 0x9c6   : > { %v1246_v55 = vadd.f32 %v1839_v53, %v1244_v54 }
 0x9c7   : > { %1351 = vmatpush.msrb.mxu1 %v783_v29 }
 0x9c8   : > { %1729 = vmatmul.msk.f32.vlgmr.msra.gmra.mxu2 %vm869_vm12, %v1246_v55  ;;  %1730 = vmatmul.msk.f32.vlgmr.msrb.gmra.mxu0 %vm869_vm12, %v1246_v55 }
 0x9c9   : > { %1352 = vmatpush.msrb.mxu1 %v782_v32 }
 0x9cb   : > { %1353 = vmatpush.msrb.mxu1 %v781_v34 }
 0xa45   : > { %v1292_v21 = vpop.f32.mrf.mxu0 }
 0xa46   : > { %v1293_v24 = vadd.f32 %v1292_v21, %v1249_v16 }
 0xa48   : > { %v1732_v26 = vmul.f32 -1.702, %v1293_v24 }
 0xa4a   : > { %v1301_v30 = vmul.f32 1.442695, %v1732_v26 }
 0xa4b   : > { %v1272_v31 = vpop.f32.mrf.mxu2 }
 0xa4c   : > { %1863 = vpow2.f32 %v1301_v30  ;;  %v1273_v33 = vadd.f32 %v1272_v31, %v1248_v27 }
 0xa4e   : > { %v1731_v35 = vmul.f32 -1.702, %v1273_v33 }
 0xa50   : > { %v1299_v36 = vmul.f32 1.442695, %v1731_v35 }
 0xa52   : > { %v1864_v37 = vpop.eup %1863  ;;  %1865 = vpow2.f32 %v1299_v36 }
 0xa53   : > { %v1304_v38 = vadd.f32 1.0, %v1864_v37 }
 0xa55   : > { %1867 = vrcp.f32 %v1304_v38  ;;  %v1331_v44 = vand.u32 2147483648, %v1304_v38  ;;  %v1329_v46 = vand.u32 2147483647, %v1304_v38  ;;  %vm1325_vm8 = vweird.f32 %v1304_v38 }
 0xa57   : > { %v1332_v50 = vor.u32 1.1754944e-38, %v1331_v44  ;;  %vm1330_vm10 = vcmp.eq.f32.partialorder %v1329_v46, 8.507059e+37 }
 0xa58   : > { %v1866_v39 = vpop.eup %1865 }
 0xa59   : > { %v1303_v40 = vadd.f32 1.0, %v1866_v39 }
 0xa5b   : > { %v1868_v41 = vpop.eup %1867  ;;  %1869 = vrcp.f32 %v1303_v40  ;;  %v1316_v54 = vand.u32 2147483648, %v1303_v40  ;;  %v1314_v57 = vand.u32 2147483647, %v1303_v40  ;;  %vm1310_vm13 = vweird.f32 %v1303_v40 }
 0xa5c   : > { %v1321_v42 = vmul.f32 %v1868_v41, %v1304_v38  ;;  %vm1326_vm6 = vweird.f32 %v1868_v41 }
 0xa5d   : > { %vm1327_vm9 = vmor %vm1325_vm8, %vm1326_vm6  ;;  %v1317_v59 = vor.u32 1.1754944e-38, %v1316_v54  ;;  %vm1315_vm15 = vcmp.eq.f32.partialorder %v1314_v57, 8.507059e+37 }
 0xa5e   : > { %v1322_v43 = vsub.f32 1.0, %v1321_v42 }
 0xa60   : > { %v1323_v45 = vmul.f32 %v1868_v41, %v1322_v43 }
 0xa61   : > { %v1870_v47 = vpop.eup %1869 }
 0xa62   : > { %v1324_v48 = vadd.f32 %v1868_v41, %v1323_v45  ;;  %v1306_v49 = vmul.f32 %v1870_v47, %v1303_v40  ;;  %vm1311_vm11 = vweird.f32 %v1870_v47 }
 0xa63   : > { %vm1312_vm14 = vmor %vm1310_vm13, %vm1311_vm11 }
 0xa64   : > { %v1328_v51 = vsel %vm1327_vm9, %v1868_v41, %v1324_v48  ;;  %v1307_v52 = vsub.f32 1.0, %v1306_v49 }
 0xa65   : > { %v1333_v53 = vsel %vm1330_vm10, %v1332_v50, %v1328_v51 }
 0xa66   : > { %v1336_v55 = vmul.f32 %v1333_v53, %v1293_v24  ;;  %v1308_v56 = vmul.f32 %v1870_v47, %v1307_v52 }
 0xa68   : > { %v1309_v58 = vadd.f32 %v1870_v47, %v1308_v56  ;;  %1374 = vmatmul.f32.vlgmr.msrb.gmra.mxu3 %v1336_v55 }
 0xa6a   : > { %v1313_v60 = vsel %vm1312_vm14, %v1870_v47, %v1309_v58 }
 0xa6b   : > { %v1318_v61 = vsel %vm1315_vm15, %v1317_v59, %v1313_v60 }
 0xa6c   : > { %v1335_v62 = vmul.f32 %v1318_v61, %v1273_v33 }
 0xa6e   : > { %1354 = vmatmul.f32.vlgmr.msrb.gmra.mxu1 %v1335_v62 }
 0xaeb   : > { %v1355_v0 = vpop.f32.mrf.mxu1  ;;  %v1375_v2 = vpop.f32.mrf.mxu3 }
 0xaec   : > { %v1356_v1 = vadd.f32 %v1840_v63, %v1355_v0 }
 0xaee   : > { %v1376_v3 = vadd.f32 %v1375_v2, %v1356_v1  ;;  %1383 = sbr.rel (%p1733_p1) target bundleno = 2943 (0xb7f), region = 64 }
 0xaf0   : > { %v2610_v4 = vadd.f32 %v1376_v3, %v2547_v17 }
 0xaf2   : > { %1379 = vst.msk [vmem:[#allocation2] sm:$0x1f] %vm830_vm7, %v2610_v4 }
 0xaf3   : > { %v1384_v5 = vmul.f32 %v2610_v4, %v2610_v4  ;;  %vm1385_vm0 = vcmask 520193  }
 0xaf5   : > { %v1386_v6 = vsel %vm1385_vm0, %v1384_v5, 0.0 }
 0xaf6   : > { %1387 = vadd.xlane.f32.xlu0 %v1386_v6 }
 0xb69   : > { %v1388_v7 = vpop.xlane.xlu0 %1387 }
 0xb6a   : > { %1871 = vrsqrt.f32 %v1388_v7  ;;  %vm1395_vm7 = vweird.f32 %v1388_v7 }
 0xb70   : > { %v1872_v8 = vpop.eup %1871 }
 0xb71   : > { %v1390_v9 = vmul.f32 %v1872_v8, %v1388_v7  ;;  %vm1396_vm1 = vweird.f32 %v1872_v8 }
 0xb72   : > { %vm1397_vm2 = vmor %vm1395_vm7, %vm1396_vm1 }
 0xb73   : > { %v1391_v17 = vmul.f32 %v1872_v8, %v1390_v9 }
 0xb75   : > { %v1392_v10 = vmul.f32 0.5, %v1391_v17 }
 0xb77   : > { %v1393_v11 = vsub.f32 1.5, %v1392_v10 }
 0xb79   : > { %v1394_v12 = vmul.f32 %v1872_v8, %v1393_v11 }
 0xb7b   : > { %v1398_v13 = vsel %vm1397_vm2, %v1872_v8, %v1394_v12 }
 0xb7c   : > { %v1399_v14 = vmul.f32 %v1398_v13, %v2610_v4 }
 0xb7e   : > { %1400 = vst.msk [vmem:[%s2149_s0 - $0x1] sm:$0x1e] %vm1385_vm0, %v1399_v14 }
 0xb7f PF: > { %p1734_p2 = scmp.ne.s32.totalorder %s1961_s16, 7 }
 0xb81   : > { %1404 = sbr.rel (%p1734_p2) target bundleno = 3090 (0xc12), region = 68 }
 0xb86   : > { %v1405_v15 = vmul.f32 %v2610_v4, %v2610_v4  ;;  %vm1406_vm3 = vcmask 520193  }
 0xb88   : > { %v1407_v16 = vsel %vm1406_vm3, %v1405_v15, 0.0 }
 0xb89   : > { %1408 = vadd.xlane.f32.xlu0 %v1407_v16 }
 0xbfc   : > { %v1409_v18 = vpop.xlane.xlu0 %1408 }
 0xbfd   : > { %1873 = vrsqrt.f32 %v1409_v18  ;;  %vm1416_vm5 = vweird.f32 %v1409_v18 }
 0xc03   : > { %v1874_v19 = vpop.eup %1873 }
 0xc04   : > { %v1411_v21 = vmul.f32 %v1874_v19, %v1409_v18  ;;  %vm1417_vm4 = vweird.f32 %v1874_v19 }
 0xc05   : > { %vm1418_vm6 = vmor %vm1416_vm5, %vm1417_vm4 }
 0xc06   : > { %v1412_v22 = vmul.f32 %v1874_v19, %v1411_v21 }
 0xc08   : > { %v1413_v23 = vmul.f32 0.5, %v1412_v22 }
 0xc0a   : > { %v1414_v24 = vsub.f32 1.5, %v1413_v23 }
 0xc0c   : > { %v1415_v25 = vmul.f32 %v1874_v19, %v1414_v24 }
 0xc0e   : > { %v1419_v20 = vsel %vm1418_vm6, %v1874_v19, %v1415_v25 }
 0xc0f   : > { %v1420_v26 = vmul.f32 %v1419_v20, %v2610_v4 }
 0xc11   : > { %1735 = vst.msk [vmem:[%s2149_s0 + $0x3] sm:$0x1e] %vm1406_vm3, %v1420_v26 }
 0xc12 PF: > { %p1736_p4 = scmp.ne.s32.totalorder %s1961_s16, 8 }
 0xc14   : > { %1426 = sbr.rel (%p1736_p4) target bundleno = 3237 (0xca5), region = 72 }
 0xc19   : > { %v1427_v27 = vmul.f32 %v2610_v4, %v2610_v4  ;;  %vm1428_vm8 = vcmask 520193  }
 0xc1b   : > { %v1429_v29 = vsel %vm1428_vm8, %v1427_v27, 0.0 }
 0xc1c   : > { %1430 = vadd.xlane.f32.xlu0 %v1429_v29 }
 0xc8f   : > { %v1431_v30 = vpop.xlane.xlu0 %1430 }
 0xc90   : > { %1875 = vrsqrt.f32 %v1431_v30  ;;  %vm1438_vm10 = vweird.f32 %v1431_v30 }
 0xc96   : > { %v1876_v31 = vpop.eup %1875 }
 0xc97   : > { %v1433_v32 = vmul.f32 %v1876_v31, %v1431_v30  ;;  %vm1439_vm9 = vweird.f32 %v1876_v31 }
 0xc98   : > { %vm1440_vm11 = vmor %vm1438_vm10, %vm1439_vm9 }
 0xc99   : > { %v1434_v33 = vmul.f32 %v1876_v31, %v1433_v32 }
 0xc9b   : > { %v1435_v34 = vmul.f32 0.5, %v1434_v33 }
 0xc9d   : > { %v1436_v35 = vsub.f32 1.5, %v1435_v34 }
 0xc9f   : > { %v1437_v36 = vmul.f32 %v1876_v31, %v1436_v35 }
 0xca1   : > { %v1441_v37 = vsel %vm1440_vm11, %v1876_v31, %v1437_v36 }
 0xca2   : > { %v1442_v38 = vmul.f32 %v1441_v37, %v2610_v4 }
 0xca4   : > { %1737 = vst.msk [vmem:[%s2149_s0 + $0x7] sm:$0x1e] %vm1428_vm8, %v1442_v38 }
 0xca5 PF: > { %p1738_p5 = scmp.ne.s32.totalorder %s1961_s16, 11 }
 0xca7   : > { %1448 = sbr.rel (%p1738_p5) target bundleno = 3781 (0xec5), region = 76 }
 0xcac   : > { %vm1451_vm13 = vcmask 520193   ;;  %v1485_v45 = vld [vmem:[%s2729_s8 + $0x38] sm:$0xff]  ;;  %v1484_v46 = vld [vmem:[%s2729_s8 + $0x30] sm:$0xff]  ;;  %v1483_v47 = vld [vmem:[%s2729_s8 + $0x28] sm:$0xff]  ;;  %vm1511_vm1 = vcmask 257024  }
 0xcad   : > { %v1452_v39 = vsel %vm1451_vm13, %v2610_v4, 0.0  ;;  %1498 = vmatpush.msra.mxu0 %v1485_v45  ;;  %v1482_v48 = vld [vmem:[%s2729_s8 + $0x20] sm:$0xff]  ;;  %v1481_v49 = vld [vmem:[%s2729_s8 + $0x18] sm:$0xff]  ;;  %v1480_v50 = vld [vmem:[%s2729_s8 + $0x10] sm:$0xff] }
 0xcae   : > { %1453 = vadd.xlane.f32.xlu0 %v1452_v39  ;;  %v1479_v51 = vld [vmem:[%s2729_s8 + $0x8] sm:$0xff]  ;;  %v1478_v52 = vld [vmem:[%s2729_s8] sm:$0xff] }
 0xcaf   : > { %1499 = vmatpush.msra.mxu0 %v1484_v46  ;;  %v1877_v62 = vld [vmem:[%s2723_s2 + $0x3] ss:$0 sm:$0xff] }
 0xcb1   : > { %1500 = vmatpush.msra.mxu0 %v1483_v47 }
 0xcb3   : > { %1501 = vmatpush.msra.mxu0 %v1482_v48 }
 0xcb5   : > { %1502 = vmatpush.msra.mxu0 %v1481_v49 }
 0xcb7   : > { %1503 = vmatpush.msra.mxu0 %v1480_v50 }
 0xcb9   : > { %1504 = vmatpush.msra.mxu0 %v1479_v51 }
 0xcbb   : > { %1505 = vmatpush.msra.mxu0 %v1478_v52 }
 0xd21   : > { %v1454_v40 = vpop.xlane.xlu0 %1453 }
 0xd22   : > { %v1455_v41 = vmul.f32 %v1454_v40, %v2463_v28 }
 0xd24   : > { %v1456_v42 = vsub.f32 %v2610_v4, %v1455_v41 }
 0xd26   : > { %v1457_v43 = vmul.f32 %v1456_v42, %v1456_v42 }
 0xd28   : > { %v1458_v44 = vsel %vm1451_vm13, %v1457_v43, 0.0 }
 0xd29   : > { %1459 = vadd.xlane.f32.xlu0 %v1458_v44 }
 0xd9c   : > { %v1460_v53 = vpop.xlane.xlu0 %1459 }
 0xd9d   : > { %v1461_v54 = vmul.f32 %v1460_v53, %v2463_v28  ;;  %v1878_v28 = vld [vmem:[%s2723_s2 + $0x4] ss:$0 sm:$0xff] }
 0xd9f   : > { %v1462_v55 = vadd.f32 1e-05, %v1461_v54 }
 0xda1   : > { %1879 = vrsqrt.f32 %v1462_v55  ;;  %vm1469_vm15 = vweird.f32 %v1462_v55 }
 0xda7   : > { %v1880_v56 = vpop.eup %1879 }
 0xda8   : > { %v1464_v57 = vmul.f32 %v1880_v56, %v1462_v55  ;;  %vm1470_vm14 = vweird.f32 %v1880_v56 }
 0xda9   : > { %vm1471_vm0 = vmor %vm1469_vm15, %vm1470_vm14 }
 0xdaa   : > { %v1465_v58 = vmul.f32 %v1880_v56, %v1464_v57 }
 0xdac   : > { %v1466_v59 = vmul.f32 0.5, %v1465_v58 }
 0xdae   : > { %v1467_v60 = vsub.f32 1.5, %v1466_v59 }
 0xdb0   : > { %v1468_v61 = vmul.f32 %v1880_v56, %v1467_v60 }
 0xdb2   : > { %v1472_v63 = vsel %vm1471_vm0, %v1880_v56, %v1468_v61 }
 0xdb3   : > { %v1473_v0 = vmul.f32 %v1472_v63, %v1456_v42 }
 0xdb5   : > { %v1475_v1 = vmul.f32 %v1877_v62, %v1473_v0 }
 0xdb7   : > { %v1477_v2 = vadd.f32 %v1878_v28, %v1475_v1 }
 0xdb9   : > { %v1487_v3 = vrot.slane %v1477_v2, 1 }
 0xdbb   : > { %1739 = vmatmul.msk.f32.vlgmr.msra.gmra.mxu0 %vm869_vm12, %v1487_v3 }
 0xe38   : > { %v1507_v4 = vpop.f32.mrf.mxu0 }
 0xe39   : > { %v1510_v5 = vmul.f32 %v1507_v4, %v1507_v4 }
 0xe3b   : > { %v1512_v6 = vsel %vm1511_vm1, %v1510_v5, 0.0 }
 0xe3c   : > { %1513 = vadd.xlane.f32.xlu1 %v1512_v6 }
 0xeaf   : > { %v1514_v7 = vpop.xlane.xlu1 %1513 }
 0xeb0   : > { %1881 = vrsqrt.f32 %v1514_v7  ;;  %vm1521_vm2 = vweird.f32 %v1514_v7 }
 0xeb6   : > { %v1882_v8 = vpop.eup %1881 }
 0xeb7   : > { %v1516_v9 = vmul.f32 %v1882_v8, %v1514_v7  ;;  %vm1522_vm7 = vweird.f32 %v1882_v8 }
 0xeb8   : > { %vm1523_vm3 = vmor %vm1521_vm2, %vm1522_vm7 }
 0xeb9   : > { %v1517_v17 = vmul.f32 %v1882_v8, %v1516_v9 }
 0xebb   : > { %v1518_v10 = vmul.f32 0.5, %v1517_v17 }
 0xebd   : > { %v1519_v11 = vsub.f32 1.5, %v1518_v10 }
 0xebf   : > { %v1520_v12 = vmul.f32 %v1882_v8, %v1519_v11 }
 0xec1   : > { %v1524_v13 = vsel %vm1523_vm3, %v1882_v8, %v1520_v12 }
 0xec2   : > { %v1525_v14 = vmul.f32 %v1524_v13, %v1507_v4 }
 0xec4   : > { %1526 = vst.msk [vmem:[%s430_s26] sm:$0xf] %vm1511_vm1, %v1525_v14 }
 0xec5 PF: > { %s2763_s13 = sld [smem:[#allocation9_spill]]  ;;  %s1548_s24 = sshll.u32 %s430_s26, 4  ;;  %s1549_s24 = int_to_ptr.vmem [resolvable:$true] %s1548_s24 }
 0xec6   : > { %s2764_s14 = sld [smem:[#allocation7_spill]] }
 0xec7   : > { %s2766_s28 = sld [smem:[#allocation19_spill]] }
 0xecb   : > { %s1741_s15 = sshll.u32 %s2763_s13, 2 }
 0xecc   : > { %s2767_s18 = sand.u32 1, %s2764_s14  }
 0xecd   : > { %s1546_s23 = scalar_lea.hbm %s2766_s28, %s1741_s15  ;;  %s1533_s29 = scalar_lea.sflag [#allocation4], %s2767_s18 }
 0xece   : > { %s1550_s19 = sshll.u32 %s1546_s23, 4  ;;  %s1903_s25 = scalar_lea.hbm %s2766_s28, 8  ;;  %s1551_s19 = int_to_ptr.hbm [resolvable:$true] %s1550_s19 }
 0xecf   : > { %s1897_s27 = sshra.s32 %s1551_s19, 4  ;;  %s1898_s27 = int_to_ptr.hbm [resolvable:$true] %s1897_s27 }
 0xed0   : > { %s1899_s30 = scalar_lea.hbm %s1898_s27, 4  ;;  %p1904_p10 = scmp.lt.s32.totalorder %s1898_s27, %s2766_s28 }
 0xed1   : > { %p1900_p6 = scmp.ne.s32.totalorder %s1898_s27, %s1899_s30  ;;  %p1905_p11 = scmp.lt.s32.totalorder %s1903_s25, %s1899_s30 }
 0xed3   : > { %p1901_p7 = pnand %p1900_p6, %p2092_p3  ;;  %p1906_p12 = por %p1905_p11, %p1904_p10 }
 0xed5   : > { %p1902_p8 = pneg %p1901_p7 }
 0xed7   : > { %p1907_p13 = pnand %p1906_p12, %p1902_p8 }
 0xed9   : > { %1910 = shalt.err (!%p1907_p13)
}
 0xeda   : > { %1749 = dma.vmem_to_hbm [thread:$0]  (%p2092_p3), %s1549_s24, 64, %s1551_s19, %s1533_s29  }
 0xedb PF: > { %s2768_s11 = sld [smem:[#allocation12_spill]] }
 0xedc   : > { %s2769_s26 = sld [smem:[#allocation6_spill]] }
 0xee1   : > { %p1755_p0 = scmp.ge.s32.totalorder %s2768_s11, 2 }
 0xee2   : > { %s1570_s13 = sand.u32 1, %s2769_s26  }
 0xee3   : > { %p1752_p1 = pnand %p1755_p0, %p2102_p9  ;;  %s1571_s14 = scalar_lea.sflag [#allocation4], %s1570_s13 }
 0xee5   : > { %p1753_p2 = pneg %p1752_p1 }
 0xee7   : > { %1944 = dma.done.wait (%p1753_p2), %s1571_s14, 64  }
 0xee8   : > { %1946 = vsyncadd (%p1753_p2), %s1571_s14, 4294967232  ;;  %s24_s20 = sadd.s32 1, %s2768_s11   ;;  %s2771_s13 = sld [smem:[#allocation7_spill]] }
 0xee9   : > { %p21_p4 = scmp.ge.s32.totalorder %s24_s20, 26   ;;  %s2772_s14 = sld [smem:[#allocation8_spill]] }
 0xeea   : > { %s2773_s15 = sld [smem:[#allocation17_spill]] }
 0xeeb   : > { %s2774_s16 = sld [smem:[#allocation10_spill]]  ;;  %23 = sbr.rel (!%p21_p4) target bundleno = 8 (0x8), region = 140 }
 0xeec   : > { %s2775_s17 = sld [smem:[#allocation11_spill]] }
 0xeed   : > { %s2776_s18 = sld [smem:[#allocation13_spill]] }
 0xeee   : > { %s2777_s19 = sld [smem:[#allocation15_spill]] }
 0xef0   :  { %1577 = vsyncpa [#allocation4], 1 }
 0xef1   :  { %1579 = vsyncpa [#allocation4 + $0x1], 1 }

</bundles_post_ra>
